<compile_context>
chip_gen: v5e
topology: v5e:2x2
jax: 0.10.0
libtpu: 0.0.40
codegen_flags: <defaults>
</compile_context>

<pallas_src>
import functools

import jax
import jax.numpy as jnp
from jax.experimental import pallas as pl
from jax.experimental.pallas import tpu as pltpu

_LANES = 128


def _round_up(x, m):
    return (x + m - 1) // m * m


# ---------------------------------------------------------------------------
# Fused kernel: conv1(stride s) + BN1 + ReLU -> conv2(stride 1) + BN2 + ReLU.
# One grid step == one batch element (feature map held entirely in VMEM).
# ---------------------------------------------------------------------------
def _make_block_kernel(stride, H1, W1, Cin, Cp):
    s = stride

    def kernel(xph_ref, w1_ref, b1_ref, w2_ref, b2_ref, o_ref, y1s_ref):
        # ---------------- conv1 + BN1 + ReLU ----------------
        # 9 accumulated MXU matmuls over shifted slices of the phase planes.
        acc1 = jnp.zeros((H1 * W1, Cp), jnp.float32)
        for kh in range(3):
            for kw in range(3):
                pi = (kh % s) * s + (kw % s)          # phase plane index
                hs, ws = kh // s, kw // s             # unit-stride offsets
                a = xph_ref[pi, hs:hs + H1, ws:ws + W1, :]
                # Flatten in f32 (layout no-op: 2nd-minor == 8-sublane tile),
                # cast operands to bf16 for the MXU, accumulate in f32.
                a = a.astype(jnp.float32).reshape(H1 * W1, Cin)
                acc1 = acc1 + jnp.dot(a.astype(jnp.bfloat16),
                                      w1_ref[kh * 3 + kw],
                                      preferred_element_type=jnp.float32)
        y1 = jnp.maximum(acc1 + b1_ref[...], 0.0)

        # Stage conv1 output in a zero-padded VMEM scratch (conv2 halo);
        # it never round-trips through HBM.
        y1s_ref[...] = jnp.zeros_like(y1s_ref)
        y1s_ref[1:1 + H1, 1:1 + W1, :] = y1.reshape(H1, W1, Cp)

        # ---------------- conv2 (stride 1) + BN2 + ReLU ----------------
        acc2 = jnp.zeros((H1 * W1, Cp), jnp.float32)
        for kh in range(3):
            for kw in range(3):
                a = y1s_ref[kh:kh + H1, kw:kw + W1, :].reshape(H1 * W1, Cp)
                acc2 = acc2 + jnp.dot(a.astype(jnp.bfloat16),
                                      w2_ref[kh * 3 + kw],
                                      preferred_element_type=jnp.float32)
        y2 = jnp.maximum(acc2 + b2_ref[...], 0.0)
        o_ref[...] = y2.reshape(H1, W1, Cp).astype(o_ref.dtype)

    return kernel


# ---------------------------------------------------------------------------
# Wrapper glue (pure JAX): padding, stride phase-split, BN folding, call.
# ---------------------------------------------------------------------------
def _phase_planes(x_pad, stride, H1, W1):
    """Space-to-depth split of the padded input so every in-kernel conv1 tap is
    a unit-stride slice.  Each input element lands in exactly one plane, so the
    HBM footprint stays ~1x the (padded) input -- no im2col blow-up."""
    s = stride
    Hn = (3 - 1) // s + H1
    Wn = (3 - 1) // s + W1
    planes = []
    for ph in range(s):
        for pw in range(s):
            p = x_pad[:, ph::s, pw::s, :][:, :Hn, :Wn, :]
            pad_h, pad_w = Hn - p.shape[1], Wn - p.shape[2]
            if pad_h or pad_w:
                p = jnp.pad(p, ((0, 0), (0, pad_h), (0, pad_w), (0, 0)))
            planes.append(p)
    return jnp.stack(planes, axis=1)            # (N, s*s, Hn, Wn, Cin)


def _fused_block_nhwc(x_nhwc, params, stride):
    N, H, W, Cin = x_nhwc.shape
    Cout = params["w1"].shape[-1]
    Cp = _round_up(Cout, _LANES)                # lane-dense output channels
    H1 = (H + 2 - 3) // stride + 1
    W1 = (W + 2 - 3) // stride + 1
    s = stride

    x_pad = jnp.pad(x_nhwc, ((0, 0), (1, 1), (1, 1), (0, 0)))
    x_ph = _phase_planes(x_pad.astype(jnp.bfloat16), s, H1, W1)
    _, _, Hn, Wn, _ = x_ph.shape

    def fold(w, scale, bias, cin_pad):
        # Fold BN scale into the conv weights; pad channels; bf16 weights.
        wf = w.astype(jnp.float32) * scale[None, None, None, :]
        wp = jnp.zeros((3, 3, cin_pad, Cp), jnp.float32)
        wp = wp.at[:, :, :w.shape[2], :Cout].set(wf)
        bp = jnp.zeros((1, Cp), jnp.float32).at[0, :Cout].set(bias)
        return wp.reshape(9, cin_pad, Cp).astype(jnp.bfloat16), bp

    w1m, b1 = fold(params["w1"], params["bn1_scale"], params["bn1_bias"], Cin)
    w2m, b2 = fold(params["w2"], params["bn2_scale"], params["bn2_bias"], Cp)

    kernel = _make_block_kernel(s, H1, W1, Cin, Cp)

    flops = 2 * N * H1 * W1 * 9 * (Cin * Cp + Cp * Cp)
    bytes_accessed = (x_ph.size * 2 + w1m.size * 2 + w2m.size * 2
                      + (b1.size + b2.size) * 4 + N * H1 * W1 * Cp * 4)

    out = pl.pallas_call(
        kernel,
        out_shape=jax.ShapeDtypeStruct((N, H1, W1, Cp), jnp.float32),
        grid=(N,),
        in_specs=[
            # per-batch activation tile (batch dim squeezed)
            pl.BlockSpec((None, s * s, Hn, Wn, Cin),
                         lambda n: (n, 0, 0, 0, 0)),
            # weights / biases: constant index_map -> stay VMEM-resident
            pl.BlockSpec((9, Cin, Cp), lambda n: (0, 0, 0)),
            pl.BlockSpec((1, Cp), lambda n: (0, 0)),
            pl.BlockSpec((9, Cp, Cp), lambda n: (0, 0, 0)),
            pl.BlockSpec((1, Cp), lambda n: (0, 0)),
        ],
        out_specs=pl.BlockSpec((None, H1, W1, Cp), lambda n: (n, 0, 0, 0)),
        scratch_shapes=[pltpu.VMEM((H1 + 2, W1 + 2, Cp), jnp.float32)],
        compiler_params=pltpu.CompilerParams(
            dimension_semantics=("parallel",),   # batch across TCs on v7x
            vmem_limit_bytes=32 * 1024 * 1024,
        ),
        cost_estimate=pl.CostEstimate(flops=flops, transcendentals=0,
                                      bytes_accessed=bytes_accessed),
    )(x_ph, w1m, b1, w2m, b2)

    return out[..., :Cout]


# ---------------------------------------------------------------------------
# Block parameters (deterministic init, inference-mode BN) and forward.
# ---------------------------------------------------------------------------
def init_block_params(key, in_channels, out_channels):
    k1, k2, k3, k4, k5, k6 = jax.random.split(key, 6)
    eps = 1e-5

    def make_bn(kg, kb):
        gamma = 1.0 + 0.1 * jax.random.normal(kg, (out_channels,), jnp.float32)
        beta = 0.1 * jax.random.normal(kb, (out_channels,), jnp.float32)
        running_mean = jnp.zeros((out_channels,), jnp.float32)
        running_var = jnp.ones((out_channels,), jnp.float32)
        scale = gamma / jnp.sqrt(running_var + eps)
        bias = beta - running_mean * scale
        return scale, bias

    params = {
        # conv weights stored HWIO (kh, kw, cin, cout)
        "w1": 0.1 * jax.random.normal(k1, (3, 3, in_channels, out_channels),
                                      jnp.float32),
        "w2": 0.1 * jax.random.normal(k2, (3, 3, out_channels, out_channels),
                                      jnp.float32),
    }
    params["bn1_scale"], params["bn1_bias"] = make_bn(k3, k4)
    params["bn2_scale"], params["bn2_bias"] = make_bn(k5, k6)
    return params


@functools.partial(jax.jit, static_argnames=("stride",))
def block_forward(params, x_nchw, stride):
    x = jnp.transpose(x_nchw, (0, 2, 3, 1))          # NCHW -> NHWC
    y = _fused_block_nhwc(x, params, stride)         # (N, H1, W1, Cout)
    return jnp.transpose(y, (0, 3, 1, 2))            # NHWC -> NCHW


def block_reference(params, x_nchw, stride):
    """Pure-JAX f32 reference (inference-mode BN) for a loose numeric check."""
    def conv_bn_relu(x, w, scale, bias, s):
        y = jax.lax.conv_general_dilated(
            x, w, window_strides=(s, s), padding=((1, 1), (1, 1)),
            dimension_numbers=("NCHW", "HWIO", "NCHW"))
        y = y * scale[None, :, None, None] + bias[None, :, None, None]
        return jnp.maximum(y, 0.0)

    x = x_nchw.astype(jnp.float32)
    y = conv_bn_relu(x, params["w1"], params["bn1_scale"],
                     params["bn1_bias"], stride)
    y = conv_bn_relu(y, params["w2"], params["bn2_scale"],
                     params["bn2_bias"], 1)
    return y


if __name__ == "__main__":
    key = jax.random.PRNGKey(0)
    kx, kp = jax.random.split(key)

    batch, in_channels, out_channels, spatial, stride = 2, 4, 8, 16, 2
    x = jax.random.normal(kx, (batch, in_channels, spatial, spatial),
                          jnp.float32)
    params = init_block_params(kp, in_channels, out_channels)

    y = block_forward(params, x, stride)
    jax.block_until_ready(y)

    expected_shape = (batch, out_channels, spatial // stride, spatial // stride)
    assert y.shape == expected_shape, (y.shape, expected_shape)
    assert bool(jnp.all(y >= 0.0))  # ReLU output is non-negative

    # Loose numeric check vs f32 reference (kernel uses bf16 operands,
    # f32 accumulation).
    y_ref = block_reference(params, x, stride)
    max_err = float(jnp.max(jnp.abs(y - y_ref)))
    assert bool(jnp.allclose(y, y_ref, atol=1e-1, rtol=1e-1)), max_err

    print("KERNEL_OK")
</pallas_src>

<mosaic_0001>
module attributes {stable_mosaic.version = 11 : i64} {
  func.func @kernel(%arg0: i32, %arg1: memref<1x4x9x9x4xbf16, #tpu.memory_space<vmem>>, %arg2: memref<9x4x128xbf16, #tpu.memory_space<vmem>>, %arg3: memref<1x128xf32, #tpu.memory_space<vmem>>, %arg4: memref<9x128x128xbf16, #tpu.memory_space<vmem>>, %arg5: memref<1x128xf32, #tpu.memory_space<vmem>>, %arg6: memref<1x8x8x128xf32, #tpu.memory_space<vmem>>, %arg7: memref<10x10x128xf32, #tpu.memory_space<vmem>>) attributes {dimension_semantics = [#tpu.dimension_semantics<parallel>], iteration_bounds = array<i64: 2>, scalar_prefetch = 0 : i64, scratch_operands = 1 : i64, tpu.core_type = #tpu.core_type<tc>, window_params = [{transform_indices = @transform_0, window_bounds = array<i64: 1, 4, 9, 9, 4>}, {pipeline_mode = #tpu.pipeline_mode<synchronous>, transform_indices = @transform_1, window_bounds = array<i64: 9, 4, 128>}, {pipeline_mode = #tpu.pipeline_mode<synchronous>, transform_indices = @transform_2, window_bounds = array<i64: 1, 128>}, {pipeline_mode = #tpu.pipeline_mode<synchronous>, transform_indices = @transform_3, window_bounds = array<i64: 9, 128, 128>}, {pipeline_mode = #tpu.pipeline_mode<synchronous>, transform_indices = @transform_4, window_bounds = array<i64: 1, 128>}, {transform_indices = @transform_5, window_bounds = array<i64: 1, 8, 8, 128>}]} {
    %cst = arith.constant 0.000000e+00 : f32
    %0 = vector.broadcast %cst : f32 to vector<64x128xf32>
    %c0 = arith.constant 0 : index
    %c0_0 = arith.constant 0 : index
    %c0_1 = arith.constant 0 : index
    %c0_2 = arith.constant 0 : index
    %c0_3 = arith.constant 0 : index
    %1 = vector.load %arg1[%c0, %c0_0, %c0_1, %c0_2, %c0_3] : memref<1x4x9x9x4xbf16, #tpu.memory_space<vmem>>, vector<1x1x8x8x4xbf16>
    %2 = vector.shape_cast %1 : vector<1x1x8x8x4xbf16> to vector<8x8x4xbf16>
    %3 = arith.extf %2 : vector<8x8x4xbf16> to vector<8x8x4xf32>
    %4 = vector.shape_cast %3 : vector<8x8x4xf32> to vector<64x4xf32>
    %5 = arith.truncf %4 : vector<64x4xf32> to vector<64x4xbf16>
    %c0_4 = arith.constant 0 : index
    %c0_5 = arith.constant 0 : index
    %c0_6 = arith.constant 0 : index
    %6 = vector.load %arg2[%c0_4, %c0_5, %c0_6] : memref<9x4x128xbf16, #tpu.memory_space<vmem>>, vector<1x4x128xbf16>
    %7 = vector.shape_cast %6 : vector<1x4x128xbf16> to vector<4x128xbf16>
    %cst_7 = arith.constant dense<0.000000e+00> : vector<64x128xf32>
    %8 = tpu.matmul %5, %7, %cst_7 {dimension_numbers = #tpu.dot_dimension_numbers<[1], [0], [0], [1], [0, 0, 1, 1], [], []>} : vector<64x4xbf16>, vector<4x128xbf16>, vector<64x128xf32> -> vector<64x128xf32>
    %9 = arith.addf %0, %8 : vector<64x128xf32>
    %c0_8 = arith.constant 0 : index
    %c1 = arith.constant 1 : index
    %c0_9 = arith.constant 0 : index
    %c0_10 = arith.constant 0 : index
    %c0_11 = arith.constant 0 : index
    %10 = vector.load %arg1[%c0_8, %c1, %c0_9, %c0_10, %c0_11] : memref<1x4x9x9x4xbf16, #tpu.memory_space<vmem>>, vector<1x1x8x8x4xbf16>
    %11 = vector.shape_cast %10 : vector<1x1x8x8x4xbf16> to vector<8x8x4xbf16>
    %12 = arith.extf %11 : vector<8x8x4xbf16> to vector<8x8x4xf32>
    %13 = vector.shape_cast %12 : vector<8x8x4xf32> to vector<64x4xf32>
    %14 = arith.truncf %13 : vector<64x4xf32> to vector<64x4xbf16>
    %c1_12 = arith.constant 1 : index
    %c0_13 = arith.constant 0 : index
    %c0_14 = arith.constant 0 : index
    %15 = vector.load %arg2[%c1_12, %c0_13, %c0_14] : memref<9x4x128xbf16, #tpu.memory_space<vmem>>, vector<1x4x128xbf16>
    %16 = vector.shape_cast %15 : vector<1x4x128xbf16> to vector<4x128xbf16>
    %cst_15 = arith.constant dense<0.000000e+00> : vector<64x128xf32>
    %17 = tpu.matmul %14, %16, %cst_15 {dimension_numbers = #tpu.dot_dimension_numbers<[1], [0], [0], [1], [0, 0, 1, 1], [], []>} : vector<64x4xbf16>, vector<4x128xbf16>, vector<64x128xf32> -> vector<64x128xf32>
    %18 = arith.addf %9, %17 : vector<64x128xf32>
    %c0_16 = arith.constant 0 : index
    %c0_17 = arith.constant 0 : index
    %c0_18 = arith.constant 0 : index
    %c1_19 = arith.constant 1 : index
    %c0_20 = arith.constant 0 : index
    %19 = vector.load %arg1[%c0_16, %c0_17, %c0_18, %c1_19, %c0_20] : memref<1x4x9x9x4xbf16, #tpu.memory_space<vmem>>, vector<1x1x8x8x4xbf16>
    %20 = vector.shape_cast %19 : vector<1x1x8x8x4xbf16> to vector<8x8x4xbf16>
    %21 = arith.extf %20 : vector<8x8x4xbf16> to vector<8x8x4xf32>
    %22 = vector.shape_cast %21 : vector<8x8x4xf32> to vector<64x4xf32>
    %23 = arith.truncf %22 : vector<64x4xf32> to vector<64x4xbf16>
    %c2 = arith.constant 2 : index
    %c0_21 = arith.constant 0 : index
    %c0_22 = arith.constant 0 : index
    %24 = vector.load %arg2[%c2, %c0_21, %c0_22] : memref<9x4x128xbf16, #tpu.memory_space<vmem>>, vector<1x4x128xbf16>
    %25 = vector.shape_cast %24 : vector<1x4x128xbf16> to vector<4x128xbf16>
    %cst_23 = arith.constant dense<0.000000e+00> : vector<64x128xf32>
    %26 = tpu.matmul %23, %25, %cst_23 {dimension_numbers = #tpu.dot_dimension_numbers<[1], [0], [0], [1], [0, 0, 1, 1], [], []>} : vector<64x4xbf16>, vector<4x128xbf16>, vector<64x128xf32> -> vector<64x128xf32>
    %27 = arith.addf %18, %26 : vector<64x128xf32>
    %c0_24 = arith.constant 0 : index
    %c2_25 = arith.constant 2 : index
    %c0_26 = arith.constant 0 : index
    %c0_27 = arith.constant 0 : index
    %c0_28 = arith.constant 0 : index
    %28 = vector.load %arg1[%c0_24, %c2_25, %c0_26, %c0_27, %c0_28] : memref<1x4x9x9x4xbf16, #tpu.memory_space<vmem>>, vector<1x1x8x8x4xbf16>
    %29 = vector.shape_cast %28 : vector<1x1x8x8x4xbf16> to vector<8x8x4xbf16>
    %30 = arith.extf %29 : vector<8x8x4xbf16> to vector<8x8x4xf32>
    %31 = vector.shape_cast %30 : vector<8x8x4xf32> to vector<64x4xf32>
    %32 = arith.truncf %31 : vector<64x4xf32> to vector<64x4xbf16>
    %c3 = arith.constant 3 : index
    %c0_29 = arith.constant 0 : index
    %c0_30 = arith.constant 0 : index
    %33 = vector.load %arg2[%c3, %c0_29, %c0_30] : memref<9x4x128xbf16, #tpu.memory_space<vmem>>, vector<1x4x128xbf16>
    %34 = vector.shape_cast %33 : vector<1x4x128xbf16> to vector<4x128xbf16>
    %cst_31 = arith.constant dense<0.000000e+00> : vector<64x128xf32>
    %35 = tpu.matmul %32, %34, %cst_31 {dimension_numbers = #tpu.dot_dimension_numbers<[1], [0], [0], [1], [0, 0, 1, 1], [], []>} : vector<64x4xbf16>, vector<4x128xbf16>, vector<64x128xf32> -> vector<64x128xf32>
    %36 = arith.addf %27, %35 : vector<64x128xf32>
    %c0_32 = arith.constant 0 : index
    %c3_33 = arith.constant 3 : index
    %c0_34 = arith.constant 0 : index
    %c0_35 = arith.constant 0 : index
    %c0_36 = arith.constant 0 : index
    %37 = vector.load %arg1[%c0_32, %c3_33, %c0_34, %c0_35, %c0_36] : memref<1x4x9x9x4xbf16, #tpu.memory_space<vmem>>, vector<1x1x8x8x4xbf16>
    %38 = vector.shape_cast %37 : vector<1x1x8x8x4xbf16> to vector<8x8x4xbf16>
    %39 = arith.extf %38 : vector<8x8x4xbf16> to vector<8x8x4xf32>
    %40 = vector.shape_cast %39 : vector<8x8x4xf32> to vector<64x4xf32>
    %41 = arith.truncf %40 : vector<64x4xf32> to vector<64x4xbf16>
    %c4 = arith.constant 4 : index
    %c0_37 = arith.constant 0 : index
    %c0_38 = arith.constant 0 : index
    %42 = vector.load %arg2[%c4, %c0_37, %c0_38] : memref<9x4x128xbf16, #tpu.memory_space<vmem>>, vector<1x4x128xbf16>
    %43 = vector.shape_cast %42 : vector<1x4x128xbf16> to vector<4x128xbf16>
    %cst_39 = arith.constant dense<0.000000e+00> : vector<64x128xf32>
    %44 = tpu.matmul %41, %43, %cst_39 {dimension_numbers = #tpu.dot_dimension_numbers<[1], [0], [0], [1], [0, 0, 1, 1], [], []>} : vector<64x4xbf16>, vector<4x128xbf16>, vector<64x128xf32> -> vector<64x128xf32>
    %45 = arith.addf %36, %44 : vector<64x128xf32>
    %c0_40 = arith.constant 0 : index
    %c2_41 = arith.constant 2 : index
    %c0_42 = arith.constant 0 : index
    %c1_43 = arith.constant 1 : index
    %c0_44 = arith.constant 0 : index
    %46 = vector.load %arg1[%c0_40, %c2_41, %c0_42, %c1_43, %c0_44] : memref<1x4x9x9x4xbf16, #tpu.memory_space<vmem>>, vector<1x1x8x8x4xbf16>
    %47 = vector.shape_cast %46 : vector<1x1x8x8x4xbf16> to vector<8x8x4xbf16>
    %48 = arith.extf %47 : vector<8x8x4xbf16> to vector<8x8x4xf32>
    %49 = vector.shape_cast %48 : vector<8x8x4xf32> to vector<64x4xf32>
    %50 = arith.truncf %49 : vector<64x4xf32> to vector<64x4xbf16>
    %c5 = arith.constant 5 : index
    %c0_45 = arith.constant 0 : index
    %c0_46 = arith.constant 0 : index
    %51 = vector.load %arg2[%c5, %c0_45, %c0_46] : memref<9x4x128xbf16, #tpu.memory_space<vmem>>, vector<1x4x128xbf16>
    %52 = vector.shape_cast %51 : vector<1x4x128xbf16> to vector<4x128xbf16>
    %cst_47 = arith.constant dense<0.000000e+00> : vector<64x128xf32>
    %53 = tpu.matmul %50, %52, %cst_47 {dimension_numbers = #tpu.dot_dimension_numbers<[1], [0], [0], [1], [0, 0, 1, 1], [], []>} : vector<64x4xbf16>, vector<4x128xbf16>, vector<64x128xf32> -> vector<64x128xf32>
    %54 = arith.addf %45, %53 : vector<64x128xf32>
    %c0_48 = arith.constant 0 : index
    %c0_49 = arith.constant 0 : index
    %c1_50 = arith.constant 1 : index
    %c0_51 = arith.constant 0 : index
    %c0_52 = arith.constant 0 : index
    %55 = vector.load %arg1[%c0_48, %c0_49, %c1_50, %c0_51, %c0_52] : memref<1x4x9x9x4xbf16, #tpu.memory_space<vmem>>, vector<1x1x8x8x4xbf16>
    %56 = vector.shape_cast %55 : vector<1x1x8x8x4xbf16> to vector<8x8x4xbf16>
    %57 = arith.extf %56 : vector<8x8x4xbf16> to vector<8x8x4xf32>
    %58 = vector.shape_cast %57 : vector<8x8x4xf32> to vector<64x4xf32>
    %59 = arith.truncf %58 : vector<64x4xf32> to vector<64x4xbf16>
    %c6 = arith.constant 6 : index
    %c0_53 = arith.constant 0 : index
    %c0_54 = arith.constant 0 : index
    %60 = vector.load %arg2[%c6, %c0_53, %c0_54] : memref<9x4x128xbf16, #tpu.memory_space<vmem>>, vector<1x4x128xbf16>
    %61 = vector.shape_cast %60 : vector<1x4x128xbf16> to vector<4x128xbf16>
    %cst_55 = arith.constant dense<0.000000e+00> : vector<64x128xf32>
    %62 = tpu.matmul %59, %61, %cst_55 {dimension_numbers = #tpu.dot_dimension_numbers<[1], [0], [0], [1], [0, 0, 1, 1], [], []>} : vector<64x4xbf16>, vector<4x128xbf16>, vector<64x128xf32> -> vector<64x128xf32>
    %63 = arith.addf %54, %62 : vector<64x128xf32>
    %c0_56 = arith.constant 0 : index
    %c1_57 = arith.constant 1 : index
    %c1_58 = arith.constant 1 : index
    %c0_59 = arith.constant 0 : index
    %c0_60 = arith.constant 0 : index
    %64 = vector.load %arg1[%c0_56, %c1_57, %c1_58, %c0_59, %c0_60] : memref<1x4x9x9x4xbf16, #tpu.memory_space<vmem>>, vector<1x1x8x8x4xbf16>
    %65 = vector.shape_cast %64 : vector<1x1x8x8x4xbf16> to vector<8x8x4xbf16>
    %66 = arith.extf %65 : vector<8x8x4xbf16> to vector<8x8x4xf32>
    %67 = vector.shape_cast %66 : vector<8x8x4xf32> to vector<64x4xf32>
    %68 = arith.truncf %67 : vector<64x4xf32> to vector<64x4xbf16>
    %c7 = arith.constant 7 : index
    %c0_61 = arith.constant 0 : index
    %c0_62 = arith.constant 0 : index
    %69 = vector.load %arg2[%c7, %c0_61, %c0_62] : memref<9x4x128xbf16, #tpu.memory_space<vmem>>, vector<1x4x128xbf16>
    %70 = vector.shape_cast %69 : vector<1x4x128xbf16> to vector<4x128xbf16>
    %cst_63 = arith.constant dense<0.000000e+00> : vector<64x128xf32>
    %71 = tpu.matmul %68, %70, %cst_63 {dimension_numbers = #tpu.dot_dimension_numbers<[1], [0], [0], [1], [0, 0, 1, 1], [], []>} : vector<64x4xbf16>, vector<4x128xbf16>, vector<64x128xf32> -> vector<64x128xf32>
    %72 = arith.addf %63, %71 : vector<64x128xf32>
    %c0_64 = arith.constant 0 : index
    %c0_65 = arith.constant 0 : index
    %c1_66 = arith.constant 1 : index
    %c1_67 = arith.constant 1 : index
    %c0_68 = arith.constant 0 : index
    %73 = vector.load %arg1[%c0_64, %c0_65, %c1_66, %c1_67, %c0_68] : memref<1x4x9x9x4xbf16, #tpu.memory_space<vmem>>, vector<1x1x8x8x4xbf16>
    %74 = vector.shape_cast %73 : vector<1x1x8x8x4xbf16> to vector<8x8x4xbf16>
    %75 = arith.extf %74 : vector<8x8x4xbf16> to vector<8x8x4xf32>
    %76 = vector.shape_cast %75 : vector<8x8x4xf32> to vector<64x4xf32>
    %77 = arith.truncf %76 : vector<64x4xf32> to vector<64x4xbf16>
    %c8 = arith.constant 8 : index
    %c0_69 = arith.constant 0 : index
    %c0_70 = arith.constant 0 : index
    %78 = vector.load %arg2[%c8, %c0_69, %c0_70] : memref<9x4x128xbf16, #tpu.memory_space<vmem>>, vector<1x4x128xbf16>
    %79 = vector.shape_cast %78 : vector<1x4x128xbf16> to vector<4x128xbf16>
    %cst_71 = arith.constant dense<0.000000e+00> : vector<64x128xf32>
    %80 = tpu.matmul %77, %79, %cst_71 {dimension_numbers = #tpu.dot_dimension_numbers<[1], [0], [0], [1], [0, 0, 1, 1], [], []>} : vector<64x4xbf16>, vector<4x128xbf16>, vector<64x128xf32> -> vector<64x128xf32>
    %81 = arith.addf %72, %80 : vector<64x128xf32>
    %c0_72 = arith.constant 0 : index
    %c0_73 = arith.constant 0 : index
    %82 = vector.load %arg3[%c0_72, %c0_73] : memref<1x128xf32, #tpu.memory_space<vmem>>, vector<1x128xf32>
    %83 = vector.broadcast %82 : vector<1x128xf32> to vector<64x128xf32>
    %84 = arith.addf %81, %83 : vector<64x128xf32>
    %cst_74 = arith.constant 0.000000e+00 : f32
    %85 = vector.broadcast %cst_74 : f32 to vector<64x128xf32>
    %86 = arith.maximumf %84, %85 : vector<64x128xf32>
    %cst_75 = arith.constant 0.000000e+00 : f32
    %87 = vector.broadcast %cst_75 : f32 to vector<10x10x128xf32>
    %c0_76 = arith.constant 0 : index
    %c0_77 = arith.constant 0 : index
    %c0_78 = arith.constant 0 : index
    %88 = vector.load %arg7[%c0_76, %c0_77, %c0_78] : memref<10x10x128xf32, #tpu.memory_space<vmem>>, vector<10x10x128xf32>
    tpu.vector_store %arg7[%c0_76, %c0_77, %c0_78], %87 {strides = array<i32>} : memref<10x10x128xf32, #tpu.memory_space<vmem>>, vector<10x10x128xf32>,
    %89 = vector.shape_cast %86 : vector<64x128xf32> to vector<8x8x128xf32>
    %c1_79 = arith.constant 1 : index
    %c1_80 = arith.constant 1 : index
    %c0_81 = arith.constant 0 : index
    %90 = vector.load %arg7[%c1_79, %c1_80, %c0_81] : memref<10x10x128xf32, #tpu.memory_space<vmem>>, vector<8x8x128xf32>
    tpu.vector_store %arg7[%c1_79, %c1_80, %c0_81], %89 {strides = array<i32>} : memref<10x10x128xf32, #tpu.memory_space<vmem>>, vector<8x8x128xf32>,
    %cst_82 = arith.constant 0.000000e+00 : f32
    %91 = vector.broadcast %cst_82 : f32 to vector<64x128xf32>
    %c0_83 = arith.constant 0 : index
    %c0_84 = arith.constant 0 : index
    %c0_85 = arith.constant 0 : index
    %92 = vector.load %arg7[%c0_83, %c0_84, %c0_85] : memref<10x10x128xf32, #tpu.memory_space<vmem>>, vector<8x8x128xf32>
    %93 = vector.shape_cast %92 : vector<8x8x128xf32> to vector<64x128xf32>
    %94 = arith.truncf %93 : vector<64x128xf32> to vector<64x128xbf16>
    %c0_86 = arith.constant 0 : index
    %c0_87 = arith.constant 0 : index
    %c0_88 = arith.constant 0 : index
    %95 = vector.load %arg4[%c0_86, %c0_87, %c0_88] : memref<9x128x128xbf16, #tpu.memory_space<vmem>>, vector<1x128x128xbf16>
    %96 = vector.shape_cast %95 : vector<1x128x128xbf16> to vector<128x128xbf16>
    %cst_89 = arith.constant dense<0.000000e+00> : vector<64x128xf32>
    %97 = tpu.matmul %94, %96, %cst_89 {dimension_numbers = #tpu.dot_dimension_numbers<[1], [0], [0], [1], [0, 0, 1, 1], [], []>} : vector<64x128xbf16>, vector<128x128xbf16>, vector<64x128xf32> -> vector<64x128xf32>
    %98 = arith.addf %91, %97 : vector<64x128xf32>
    %c0_90 = arith.constant 0 : index
    %c1_91 = arith.constant 1 : index
    %c0_92 = arith.constant 0 : index
    %99 = vector.load %arg7[%c0_90, %c1_91, %c0_92] : memref<10x10x128xf32, #tpu.memory_space<vmem>>, vector<8x8x128xf32>
    %100 = vector.shape_cast %99 : vector<8x8x128xf32> to vector<64x128xf32>
    %101 = arith.truncf %100 : vector<64x128xf32> to vector<64x128xbf16>
    %c1_93 = arith.constant 1 : index
    %c0_94 = arith.constant 0 : index
    %c0_95 = arith.constant 0 : index
    %102 = vector.load %arg4[%c1_93, %c0_94, %c0_95] : memref<9x128x128xbf16, #tpu.memory_space<vmem>>, vector<1x128x128xbf16>
    %103 = vector.shape_cast %102 : vector<1x128x128xbf16> to vector<128x128xbf16>
    %cst_96 = arith.constant dense<0.000000e+00> : vector<64x128xf32>
    %104 = tpu.matmul %101, %103, %cst_96 {dimension_numbers = #tpu.dot_dimension_numbers<[1], [0], [0], [1], [0, 0, 1, 1], [], []>} : vector<64x128xbf16>, vector<128x128xbf16>, vector<64x128xf32> -> vector<64x128xf32>
    %105 = arith.addf %98, %104 : vector<64x128xf32>
    %c0_97 = arith.constant 0 : index
    %c2_98 = arith.constant 2 : index
    %c0_99 = arith.constant 0 : index
    %106 = vector.load %arg7[%c0_97, %c2_98, %c0_99] : memref<10x10x128xf32, #tpu.memory_space<vmem>>, vector<8x8x128xf32>
    %107 = vector.shape_cast %106 : vector<8x8x128xf32> to vector<64x128xf32>
    %108 = arith.truncf %107 : vector<64x128xf32> to vector<64x128xbf16>
    %c2_100 = arith.constant 2 : index
    %c0_101 = arith.constant 0 : index
    %c0_102 = arith.constant 0 : index
    %109 = vector.load %arg4[%c2_100, %c0_101, %c0_102] : memref<9x128x128xbf16, #tpu.memory_space<vmem>>, vector<1x128x128xbf16>
    %110 = vector.shape_cast %109 : vector<1x128x128xbf16> to vector<128x128xbf16>
    %cst_103 = arith.constant dense<0.000000e+00> : vector<64x128xf32>
    %111 = tpu.matmul %108, %110, %cst_103 {dimension_numbers = #tpu.dot_dimension_numbers<[1], [0], [0], [1], [0, 0, 1, 1], [], []>} : vector<64x128xbf16>, vector<128x128xbf16>, vector<64x128xf32> -> vector<64x128xf32>
    %112 = arith.addf %105, %111 : vector<64x128xf32>
    %c1_104 = arith.constant 1 : index
    %c0_105 = arith.constant 0 : index
    %c0_106 = arith.constant 0 : index
    %113 = vector.load %arg7[%c1_104, %c0_105, %c0_106] : memref<10x10x128xf32, #tpu.memory_space<vmem>>, vector<8x8x128xf32>
    %114 = vector.shape_cast %113 : vector<8x8x128xf32> to vector<64x128xf32>
    %115 = arith.truncf %114 : vector<64x128xf32> to vector<64x128xbf16>
    %c3_107 = arith.constant 3 : index
    %c0_108 = arith.constant 0 : index
    %c0_109 = arith.constant 0 : index
    %116 = vector.load %arg4[%c3_107, %c0_108, %c0_109] : memref<9x128x128xbf16, #tpu.memory_space<vmem>>, vector<1x128x128xbf16>
    %117 = vector.shape_cast %116 : vector<1x128x128xbf16> to vector<128x128xbf16>
    %cst_110 = arith.constant dense<0.000000e+00> : vector<64x128xf32>
    %118 = tpu.matmul %115, %117, %cst_110 {dimension_numbers = #tpu.dot_dimension_numbers<[1], [0], [0], [1], [0, 0, 1, 1], [], []>} : vector<64x128xbf16>, vector<128x128xbf16>, vector<64x128xf32> -> vector<64x128xf32>
    %119 = arith.addf %112, %118 : vector<64x128xf32>
    %c1_111 = arith.constant 1 : index
    %c1_112 = arith.constant 1 : index
    %c0_113 = arith.constant 0 : index
    %120 = vector.load %arg7[%c1_111, %c1_112, %c0_113] : memref<10x10x128xf32, #tpu.memory_space<vmem>>, vector<8x8x128xf32>
    %121 = vector.shape_cast %120 : vector<8x8x128xf32> to vector<64x128xf32>
    %122 = arith.truncf %121 : vector<64x128xf32> to vector<64x128xbf16>
    %c4_114 = arith.constant 4 : index
    %c0_115 = arith.constant 0 : index
    %c0_116 = arith.constant 0 : index
    %123 = vector.load %arg4[%c4_114, %c0_115, %c0_116] : memref<9x128x128xbf16, #tpu.memory_space<vmem>>, vector<1x128x128xbf16>
    %124 = vector.shape_cast %123 : vector<1x128x128xbf16> to vector<128x128xbf16>
    %cst_117 = arith.constant dense<0.000000e+00> : vector<64x128xf32>
    %125 = tpu.matmul %122, %124, %cst_117 {dimension_numbers = #tpu.dot_dimension_numbers<[1], [0], [0], [1], [0, 0, 1, 1], [], []>} : vector<64x128xbf16>, vector<128x128xbf16>, vector<64x128xf32> -> vector<64x128xf32>
    %126 = arith.addf %119, %125 : vector<64x128xf32>
    %c1_118 = arith.constant 1 : index
    %c2_119 = arith.constant 2 : index
    %c0_120 = arith.constant 0 : index
    %127 = vector.load %arg7[%c1_118, %c2_119, %c0_120] : memref<10x10x128xf32, #tpu.memory_space<vmem>>, vector<8x8x128xf32>
    %128 = vector.shape_cast %127 : vector<8x8x128xf32> to vector<64x128xf32>
    %129 = arith.truncf %128 : vector<64x128xf32> to vector<64x128xbf16>
    %c5_121 = arith.constant 5 : index
    %c0_122 = arith.constant 0 : index
    %c0_123 = arith.constant 0 : index
    %130 = vector.load %arg4[%c5_121, %c0_122, %c0_123] : memref<9x128x128xbf16, #tpu.memory_space<vmem>>, vector<1x128x128xbf16>
    %131 = vector.shape_cast %130 : vector<1x128x128xbf16> to vector<128x128xbf16>
    %cst_124 = arith.constant dense<0.000000e+00> : vector<64x128xf32>
    %132 = tpu.matmul %129, %131, %cst_124 {dimension_numbers = #tpu.dot_dimension_numbers<[1], [0], [0], [1], [0, 0, 1, 1], [], []>} : vector<64x128xbf16>, vector<128x128xbf16>, vector<64x128xf32> -> vector<64x128xf32>
    %133 = arith.addf %126, %132 : vector<64x128xf32>
    %c2_125 = arith.constant 2 : index
    %c0_126 = arith.constant 0 : index
    %c0_127 = arith.constant 0 : index
    %134 = vector.load %arg7[%c2_125, %c0_126, %c0_127] : memref<10x10x128xf32, #tpu.memory_space<vmem>>, vector<8x8x128xf32>
    %135 = vector.shape_cast %134 : vector<8x8x128xf32> to vector<64x128xf32>
    %136 = arith.truncf %135 : vector<64x128xf32> to vector<64x128xbf16>
    %c6_128 = arith.constant 6 : index
    %c0_129 = arith.constant 0 : index
    %c0_130 = arith.constant 0 : index
    %137 = vector.load %arg4[%c6_128, %c0_129, %c0_130] : memref<9x128x128xbf16, #tpu.memory_space<vmem>>, vector<1x128x128xbf16>
    %138 = vector.shape_cast %137 : vector<1x128x128xbf16> to vector<128x128xbf16>
    %cst_131 = arith.constant dense<0.000000e+00> : vector<64x128xf32>
    %139 = tpu.matmul %136, %138, %cst_131 {dimension_numbers = #tpu.dot_dimension_numbers<[1], [0], [0], [1], [0, 0, 1, 1], [], []>} : vector<64x128xbf16>, vector<128x128xbf16>, vector<64x128xf32> -> vector<64x128xf32>
    %140 = arith.addf %133, %139 : vector<64x128xf32>
    %c2_132 = arith.constant 2 : index
    %c1_133 = arith.constant 1 : index
    %c0_134 = arith.constant 0 : index
    %141 = vector.load %arg7[%c2_132, %c1_133, %c0_134] : memref<10x10x128xf32, #tpu.memory_space<vmem>>, vector<8x8x128xf32>
    %142 = vector.shape_cast %141 : vector<8x8x128xf32> to vector<64x128xf32>
    %143 = arith.truncf %142 : vector<64x128xf32> to vector<64x128xbf16>
    %c7_135 = arith.constant 7 : index
    %c0_136 = arith.constant 0 : index
    %c0_137 = arith.constant 0 : index
    %144 = vector.load %arg4[%c7_135, %c0_136, %c0_137] : memref<9x128x128xbf16, #tpu.memory_space<vmem>>, vector<1x128x128xbf16>
    %145 = vector.shape_cast %144 : vector<1x128x128xbf16> to vector<128x128xbf16>
    %cst_138 = arith.constant dense<0.000000e+00> : vector<64x128xf32>
    %146 = tpu.matmul %143, %145, %cst_138 {dimension_numbers = #tpu.dot_dimension_numbers<[1], [0], [0], [1], [0, 0, 1, 1], [], []>} : vector<64x128xbf16>, vector<128x128xbf16>, vector<64x128xf32> -> vector<64x128xf32>
    %147 = arith.addf %140, %146 : vector<64x128xf32>
    %c2_139 = arith.constant 2 : index
    %c2_140 = arith.constant 2 : index
    %c0_141 = arith.constant 0 : index
    %148 = vector.load %arg7[%c2_139, %c2_140, %c0_141] : memref<10x10x128xf32, #tpu.memory_space<vmem>>, vector<8x8x128xf32>
    %149 = vector.shape_cast %148 : vector<8x8x128xf32> to vector<64x128xf32>
    %150 = arith.truncf %149 : vector<64x128xf32> to vector<64x128xbf16>
    %c8_142 = arith.constant 8 : index
    %c0_143 = arith.constant 0 : index
    %c0_144 = arith.constant 0 : index
    %151 = vector.load %arg4[%c8_142, %c0_143, %c0_144] : memref<9x128x128xbf16, #tpu.memory_space<vmem>>, vector<1x128x128xbf16>
    %152 = vector.shape_cast %151 : vector<1x128x128xbf16> to vector<128x128xbf16>
    %cst_145 = arith.constant dense<0.000000e+00> : vector<64x128xf32>
    %153 = tpu.matmul %150, %152, %cst_145 {dimension_numbers = #tpu.dot_dimension_numbers<[1], [0], [0], [1], [0, 0, 1, 1], [], []>} : vector<64x128xbf16>, vector<128x128xbf16>, vector<64x128xf32> -> vector<64x128xf32>
    %154 = arith.addf %147, %153 : vector<64x128xf32>
    %c0_146 = arith.constant 0 : index
    %c0_147 = arith.constant 0 : index
    %155 = vector.load %arg5[%c0_146, %c0_147] : memref<1x128xf32, #tpu.memory_space<vmem>>, vector<1x128xf32>
    %156 = vector.broadcast %155 : vector<1x128xf32> to vector<64x128xf32>
    %157 = arith.addf %154, %156 : vector<64x128xf32>
    %cst_148 = arith.constant 0.000000e+00 : f32
    %158 = vector.broadcast %cst_148 : f32 to vector<64x128xf32>
    %159 = arith.maximumf %157, %158 : vector<64x128xf32>
    %160 = vector.shape_cast %159 : vector<64x128xf32> to vector<8x8x128xf32>
    %c0_149 = arith.constant 0 : index
    %c0_150 = arith.constant 0 : index
    %c0_151 = arith.constant 0 : index
    %c0_152 = arith.constant 0 : index
    %161 = vector.load %arg6[%c0_149, %c0_150, %c0_151, %c0_152] : memref<1x8x8x128xf32, #tpu.memory_space<vmem>>, vector<1x8x8x128xf32>
    %162 = vector.shape_cast %161 : vector<1x8x8x128xf32> to vector<8x8x128xf32>
    %163 = vector.shape_cast %160 : vector<8x8x128xf32> to vector<1x8x8x128xf32>
    tpu.vector_store %arg6[%c0_149, %c0_150, %c0_151, %c0_152], %163 {strides = array<i32>} : memref<1x8x8x128xf32, #tpu.memory_space<vmem>>, vector<1x8x8x128xf32>,
    return
  }
  func.func @transform_0(%arg0: i32) -> (i32, i32, i32, i32, i32) {
    %c0_i32 = arith.constant 0 : i32
    %c0_i32_0 = arith.constant 0 : i32
    %c0_i32_1 = arith.constant 0 : i32
    %c0_i32_2 = arith.constant 0 : i32
    %c0_i32_3 = arith.constant 0 : i32
    return %arg0, %c0_i32, %c0_i32_0, %c0_i32_1, %c0_i32_2 : i32, i32, i32, i32, i32
  }
  func.func @transform_1(%arg0: i32) -> (i32, i32, i32) {
    %c0_i32 = arith.constant 0 : i32
    %c0_i32_0 = arith.constant 0 : i32
    %c0_i32_1 = arith.constant 0 : i32
    %c0_i32_2 = arith.constant 0 : i32
    return %c0_i32, %c0_i32_0, %c0_i32_1 : i32, i32, i32
  }
  func.func @transform_2(%arg0: i32) -> (i32, i32) {
    %c0_i32 = arith.constant 0 : i32
    %c0_i32_0 = arith.constant 0 : i32
    %c0_i32_1 = arith.constant 0 : i32
    return %c0_i32, %c0_i32_0 : i32, i32
  }
  func.func @transform_3(%arg0: i32) -> (i32, i32, i32) {
    %c0_i32 = arith.constant 0 : i32
    %c0_i32_0 = arith.constant 0 : i32
    %c0_i32_1 = arith.constant 0 : i32
    %c0_i32_2 = arith.constant 0 : i32
    return %c0_i32, %c0_i32_0, %c0_i32_1 : i32, i32, i32
  }
  func.func @transform_4(%arg0: i32) -> (i32, i32) {
    %c0_i32 = arith.constant 0 : i32
    %c0_i32_0 = arith.constant 0 : i32
    %c0_i32_1 = arith.constant 0 : i32
    return %c0_i32, %c0_i32_0 : i32, i32
  }
  func.func @transform_5(%arg0: i32) -> (i32, i32, i32, i32) {
    %c0_i32 = arith.constant 0 : i32
    %c0_i32_0 = arith.constant 0 : i32
    %c0_i32_1 = arith.constant 0 : i32
    %c0_i32_2 = arith.constant 0 : i32
    return %arg0, %c0_i32, %c0_i32_0, %c0_i32_1 : i32, i32, i32, i32
  }
}

</mosaic_0001>

<bundles_post_ra>
// kernel: block_forward.1
= control target key start
LH: loop header
LB: loop body
LE: loop exit
PB: predicated region body
PF: predicated region fallthrough
CT: control target
= control target key end

     0   :  { %s3005_s18 = smov 0   ;;  %s3743_s0 = inlined_call_operand.vmem [shape: bf16[2,4,9,9,4], index: 0, kind: input, shape index: {}]   ;;  %s3744_s1 = inlined_call_operand.vmem [shape: bf16[9,4,128], index: 1, kind: input, shape index: {}]   ;;  %s3745_s2 = inlined_call_operand.vmem [shape: f32[1,128], index: 2, kind: input, shape index: {}]   ;;  %s3746_s3 = inlined_call_operand.vmem [shape: bf16[9,128,128], index: 3, kind: input, shape index: {}]   ;;  %s3747_s4 = inlined_call_operand.vmem [shape: f32[1,128], index: 4, kind: input, shape index: {}]   ;;  %s3748_s5 = inlined_call_operand.vmem [shape: f32[2,8,8,128], index: 5, kind: output, shape index: {}]  }
   0x1 LB: > { %s2217_s19 = sadd.s32 4294967295, %s2972_s18   ;;  %p2221_p0 = scmp.ge.s32.totalorder %s2972_s18, 1  ;;  %s2972_s18 = sphi %s3005_s18, %s15_s18  }
   0x2   : > { %p187_p1 = scmp.lt.s32.totalorder %s2972_s18, 3 }
   0x4   : > { %p188_p2 = pnand %p2221_p0, %p187_p1 }
   0x5   : > { %p215_p3 = scmp.lt.s32.totalorder (!%p188_p2), %s2217_s19, 1 }
   0x6   : > { %191 = sbr.rel (%p188_p2) target bundleno = 576 (0x240), region = 40 }
   0xb   : > { %v2265_v0 = vld [vmem:[%s3744_s1 + $0x2] sm:$0x3]  ;;  %vm283_vm0 = vcmask 1041408   ;;  %v246_v1 = vld [vmem:[%s3744_s1] sm:$0x3]  ;;  %s3750_s19 = smov (!%p215_p3, %s2217_s19), 1 }
   0xc   : > { %v285_v2 = vsel %vm283_vm0, %v2265_v0, 0  ;;  %v329_v3 = vsel %vm283_vm0, %v246_v1, 0  ;;  %v2274_v4 = vld [vmem:[%s3744_s1 + $0x4] sm:$0x3]  ;;  %v2303_v6 = vld [vmem:[%s3744_s1 + $0x6] sm:$0x3] }
   0xd   : > { %2952 = vmatpush.bf16.msra.mxu2 %v285_v2  ;;  %2953 = vmatpush.bf16.msra.mxu3 %v329_v3  ;;  %v460_v5 = vsel %vm283_vm0, %v2274_v4, 0  ;;  %v2332_v7 = vld [vmem:[%s3744_s1 + $0x8] sm:$0x3]  ;;  %v535_v8 = vsel %vm283_vm0, %v2303_v6, 0  ;;  %s2954_s30 = smul.u32 288, %s3750_s19  ;;  %vm270_vm1 = vcmask 31744  }
   0xe   : > { %294 = vmatpush.bf16.msra.mxu0 %v285_v2  ;;  %338 = vmatpush.bf16.msra.mxu1 %v329_v3  ;;  %v610_v9 = vsel %vm283_vm0, %v2332_v7, 0  ;;  %v2382_v22 = vld [vmem:[%s3744_s1 + $0xc] sm:$0x3]  ;;  %v2411_v24 = vld [vmem:[%s3744_s1 + $0xe] sm:$0x3]  ;;  %vm408_vm2 = vcmask 1046528  }
   0xf   : > { %s3039_s8 = scalar_lea.vmem %s3743_s0, %s2954_s30  ;;  %v823_v23 = vsel %vm283_vm0, %v2382_v22, 0  ;;  %v2353_v25 = vld [vmem:[%s3744_s1 + $0xa] sm:$0x3]  ;;  %v898_v26 = vsel %vm283_vm0, %v2411_v24, 0  ;;  %v2432_v28 = vld [vmem:[%s3744_s1 + $0x10] sm:$0x3] }
  0x10   : > { %v2259_v10 = vld [vmem:[%s3039_s8 + $0x68] sm:$0xf]  ;;  %v2862_v11 = vld [vmem:[%s3039_s8 + $0x6c] sm:$0xf0]  ;;  %v2235_v12 = vld [vmem:[%s3039_s8 + $0x20] sm:$0xf] }
  0x11   : > { %469 = vmatpush.bf16.msrb.mxu2 %v460_v5  ;;  %544 = vmatpush.bf16.msrb.mxu3 %v535_v8  ;;  %v2260_v13 = vor.u32 %v2862_v11, %v2259_v10  ;;  %v2858_v14 = vld [vmem:[%s3039_s8 + $0x24] sm:$0xf0]  ;;  %v2860_v16 = vld [vmem:[%s3039_s8 + $0x4c] sm:$0xf0]  ;;  %v2227_v19 = vld [vmem:[%s3039_s8] sm:$0xf] }
  0x12   : > { %619 = vmatpush.bf16.msrb.mxu0 %v610_v9  ;;  %v2251_v15 = vld [vmem:[%s3039_s8 + $0x48] sm:$0xf]  ;;  %v2236_v17 = vor.u32 %v2858_v14, %v2235_v12  ;;  %v748_v27 = vsel %vm283_vm0, %v2353_v25, 0  ;;  %v1036_v29 = vsel %vm283_vm0, %v2432_v28, 0  ;;  %v2263_v30 = vld [vmem:[%s3039_s8 + $0x78] sm:$0xf] }
  0x13   : > { %v2252_v18 = vor.u32 %v2860_v16, %v2251_v15  ;;  %v2856_v20 = vld [vmem:[%s3039_s8 + $0x4] sm:$0xf0]  ;;  %2268 = vmatmul.msk.bf16.vlgmr.msra.gmra.mxu2 %vm270_vm1, %v2260_v13  ;;  %757 = vmatpush.bf16.msrb.mxu1 %v748_v27  ;;  %v2863_v31 = vld [vmem:[%s3039_s8 + $0x7c] sm:$0xf0]  ;;  %v2239_v32 = vld [vmem:[%s3039_s8 + $0x30] sm:$0xf] }
  0x14   : > { %v2228_v21 = vor.u32 %v2856_v20, %v2227_v19  ;;  %2272 = vmatmul.msk.bf16.vlgmr.msra.gmra.mxu3 %vm270_vm1, %v2236_v17  ;;  %v2859_v33 = vld [vmem:[%s3039_s8 + $0x34] sm:$0xf0]  ;;  %v2861_v35 = vld [vmem:[%s3039_s8 + $0x5c] sm:$0xf0]  ;;  %v2231_v36 = vld [vmem:[%s3039_s8 + $0x10] sm:$0xf]  ;;  %v2264_v38 = vor.u32 %v2863_v31, %v2263_v30 }
  0x15   : > { %2266 = vmatmul.msk.bf16.vlgmr.msra.gmra.mxu0 %vm270_vm1, %v2252_v18  ;;  %832 = vmatpush.bf16.msra.mxu2 %v823_v23  ;;  %v2255_v34 = vld [vmem:[%s3039_s8 + $0x58] sm:$0xf]  ;;  %v2240_v39 = vor.u32 %v2859_v33, %v2239_v32  ;;  %v360_v41 = vld [vmem:[%s3039_s8] sm:$0xf]  ;;  %v361_v43 = vld [vmem:[%s3039_s8 + $0x4] sm:$0x1] }
  0x16   : > { %2270 = vmatmul.msk.bf16.vlgmr.msra.gmra.mxu1 %vm270_vm1, %v2228_v21  ;;  %907 = vmatpush.bf16.msra.mxu3 %v898_v26  ;;  %v2857_v37 = vld [vmem:[%s3039_s8 + $0x14] sm:$0xf0]  ;;  %v2256_v40 = vor.u32 %v2861_v35, %v2255_v34  ;;  %v362_v44 = vld [vmem:[%s3039_s8 + $0x8] sm:$0xf]  ;;  %v363_v45 = vld [vmem:[%s3039_s8 + $0xc] sm:$0x1]  ;;  %v376_v50 = vunpack.c.l.bf16 %v360_v41  ;;  %v377_v51 = vunpack.c.l.bf16 %v361_v43 }
  0x17   : > { %1045 = vmatpush.bf16.msra.mxu0 %v1036_v29  ;;  %v2232_v42 = vor.u32 %v2857_v37, %v2231_v36  ;;  %v2337_v46 = vld [vmem:[%s3039_s8 + $0x90] sm:$0xf]  ;;  %v2338_v47 = vld [vmem:[%s3039_s8 + $0x94] sm:$0x1]  ;;  %v2339_v48 = vld [vmem:[%s3039_s8 + $0x98] sm:$0xf]  ;;  %v378_v52 = vunpack.c.l.bf16 %v362_v44  ;;  %v379_v53 = vunpack.c.l.bf16 %v363_v45 }
  0x18   : > { %v2340_v49 = vld [vmem:[%s3039_s8 + $0x9c] sm:$0x1]  ;;  %v665_v54 = vunpack.c.l.bf16 %v2337_v46  ;;  %v666_v55 = vunpack.c.l.bf16 %v2338_v47  ;;  %v667_v56 = vunpack.c.l.bf16 %v2339_v48  ;;  %v409_v58 = vrot.slane %v376_v50, 1  ;;  %v2289_v4 = vld [vmem:[%s3039_s8 + $0x90] sm:$0xf]  ;;  %s2855_s29 = sshll.u32 %s3750_s19, 6 }
  0x19   : > { %v668_v57 = vunpack.c.l.bf16 %v2340_v49  ;;  %v410_v59 = vrot.slane %v377_v51, 1  ;;  %v412_v60 = vrot.slane %v378_v52, 1  ;;  %v413_v61 = vrot.slane %v379_v53, 1  ;;  %v2864_v5 = vld [vmem:[%s3039_s8 + $0x94] sm:$0xf0]  ;;  %s3702_s7 = scalar_lea.vmem %s3748_s5, %s2855_s29 }
  0x1a   : > { %v697_v62 = vrot.slane %v665_v54, 1  ;;  %v698_v63 = vrot.slane %v666_v55, 1  ;;  %v700_v0 = vrot.slane %v667_v56, 1  ;;  %v2318_v6 = vld [vmem:[%s3039_s8 + $0xd8] sm:$0xf]  ;;  %v2290_v11 = vor.u32 %v2864_v5, %v2289_v4 }
  0x1b   : > { %v701_v1 = vrot.slane %v668_v57, 1  ;;  %v411_v2 = vsel %vm408_vm2, %v409_v58, %v410_v59  ;;  %v414_v3 = vsel %vm408_vm2, %v412_v60, %v413_v61  ;;  %v2868_v7 = vld [vmem:[%s3039_s8 + $0xdc] sm:$0xf0]  ;;  %v364_v13 = vld [vmem:[%s3039_s8 + $0x10] sm:$0xf] }
  0x1c   : > { %v699_v8 = vsel %vm408_vm2, %v697_v62, %v698_v63  ;;  %v441_v10 = vpack.c.bf16 %v414_v3, %v411_v2  ;;  %v2319_v12 = vor.u32 %v2868_v7, %v2318_v6  ;;  %v365_v15 = vld [vmem:[%s3039_s8 + $0x14] sm:$0x1]  ;;  %v366_v16 = vld [vmem:[%s3039_s8 + $0x18] sm:$0xf]  ;;  %v367_v17 = vld [vmem:[%s3039_s8 + $0x1c] sm:$0x1]  ;;  %v380_v22 = vunpack.c.l.bf16 %v364_v13 }
  0x1d   : > { %v702_v9 = vsel %vm408_vm2, %v700_v0, %v701_v1  ;;  %v2341_v18 = vld [vmem:[%s3039_s8 + $0xa0] sm:$0xf]  ;;  %v2342_v19 = vld [vmem:[%s3039_s8 + $0xa4] sm:$0x1]  ;;  %v2343_v20 = vld [vmem:[%s3039_s8 + $0xa8] sm:$0xf]  ;;  %v381_v23 = vunpack.c.l.bf16 %v365_v15  ;;  %v382_v24 = vunpack.c.l.bf16 %v366_v16  ;;  %v383_v25 = vunpack.c.l.bf16 %v367_v17 }
  0x1e   : > { %v729_v14 = vpack.c.bf16 %v702_v9, %v699_v8  ;;  %v2344_v21 = vld [vmem:[%s3039_s8 + $0xac] sm:$0x1]  ;;  %v669_v26 = vunpack.c.l.bf16 %v2341_v18  ;;  %v670_v27 = vunpack.c.l.bf16 %v2342_v19  ;;  %v671_v28 = vunpack.c.l.bf16 %v2343_v20  ;;  %v2865_v41 = vld [vmem:[%s3039_s8 + $0xa4] sm:$0xf0]  ;;  %v2869_v43 = vld [vmem:[%s3039_s8 + $0xec] sm:$0xf0] }
  0x1f   : > { %v672_v29 = vunpack.c.l.bf16 %v2344_v21  ;;  %v415_v30 = vrot.slane %v380_v22, 1  ;;  %v416_v31 = vrot.slane %v381_v23, 1  ;;  %v418_v32 = vrot.slane %v382_v24, 1  ;;  %v368_v49 = vld [vmem:[%s3039_s8 + $0x20] sm:$0xf] }
  0x20   : > { %v419_v33 = vrot.slane %v383_v25, 1  ;;  %v703_v34 = vrot.slane %v669_v26, 1  ;;  %v704_v35 = vrot.slane %v670_v27, 1  ;;  %v706_v36 = vrot.slane %v671_v28, 1  ;;  %v369_v51 = vld [vmem:[%s3039_s8 + $0x24] sm:$0x1] }
  0x21   : > { %v707_v37 = vrot.slane %v672_v29, 1  ;;  %v370_v52 = vld [vmem:[%s3039_s8 + $0x28] sm:$0xf]  ;;  %v371_v53 = vld [vmem:[%s3039_s8 + $0x2c] sm:$0x1]  ;;  %v384_v58 = vunpack.c.l.bf16 %v368_v49  ;;  %v385_v59 = vunpack.c.l.bf16 %v369_v51 }
  0x22   : > { %v705_v44 = vsel %vm408_vm2, %v703_v34, %v704_v35  ;;  %v2345_v54 = vld [vmem:[%s3039_s8 + $0xb0] sm:$0xf]  ;;  %v2346_v55 = vld [vmem:[%s3039_s8 + $0xb4] sm:$0x1]  ;;  %v2347_v56 = vld [vmem:[%s3039_s8 + $0xb8] sm:$0xf]  ;;  %v386_v60 = vunpack.c.l.bf16 %v370_v52  ;;  %v387_v61 = vunpack.c.l.bf16 %v371_v53 }
  0x23   : > { %2269 = vmatmul.msk.bf16.gmra.mxu2 %vm270_vm1, %v2264_v38  ;;  %v417_v38 = vsel %vm408_vm2, %v415_v30, %v416_v31  ;;  %v708_v45 = vsel %vm408_vm2, %v706_v36, %v707_v37  ;;  %v2348_v57 = vld [vmem:[%s3039_s8 + $0xbc] sm:$0x1]  ;;  %v673_v62 = vunpack.c.l.bf16 %v2345_v54  ;;  %v674_v63 = vunpack.c.l.bf16 %v2346_v55  ;;  %v2866_v13 = vld [vmem:[%s3039_s8 + $0xb4] sm:$0xf0]  ;;  %v2870_v15 = vld [vmem:[%s3039_s8 + $0xfc] sm:$0xf0] }
  0x24   : > { %2273 = vmatmul.msk.bf16.gmra.mxu3 %vm270_vm1, %v2240_v39  ;;  %v420_v39 = vsel %vm408_vm2, %v418_v32, %v419_v33  ;;  %v730_v50 = vpack.c.bf16 %v708_v45, %v705_v44  ;;  %v675_v0 = vunpack.c.l.bf16 %v2347_v56  ;;  %v676_v1 = vunpack.c.l.bf16 %v2348_v57  ;;  %v372_v21 = vld [vmem:[%s3039_s8 + $0x30] sm:$0xf]  ;;  %v373_v23 = vld [vmem:[%s3039_s8 + $0x34] sm:$0x1]  ;;  %v374_v24 = vld [vmem:[%s3039_s8 + $0x38] sm:$0xf] }
  0x25   : > { %2267 = vmatmul.msk.bf16.gmra.mxu0 %vm270_vm1, %v2256_v40  ;;  %v2293_v40 = vld [vmem:[%s3039_s8 + $0xa0] sm:$0xf]  ;;  %v442_v46 = vpack.c.bf16 %v420_v39, %v417_v38  ;;  %v421_v2 = vrot.slane %v384_v58, 1  ;;  %v422_v3 = vrot.slane %v385_v59, 1  ;;  %v424_v4 = vrot.slane %v386_v60, 1 }
  0x26   : > { %2271 = vmatmul.msk.bf16.gmra.mxu1 %vm270_vm1, %v2232_v42  ;;  %v2322_v42 = vld [vmem:[%s3039_s8 + $0xe8] sm:$0xf]  ;;  %v2294_v47 = vor.u32 %v2865_v41, %v2293_v40  ;;  %v425_v5 = vrot.slane %v387_v61, 1  ;;  %v709_v6 = vrot.slane %v673_v62, 1  ;;  %v710_v7 = vrot.slane %v674_v63, 1 }
  0x27   : > { %v2323_v48 = vor.u32 %v2869_v43, %v2322_v42  ;;  %v712_v8 = vrot.slane %v675_v0, 1  ;;  %v713_v9 = vrot.slane %v676_v1, 1  ;;  %v375_v25 = vld [vmem:[%s3039_s8 + $0x3c] sm:$0x1]  ;;  %v2349_v26 = vld [vmem:[%s3039_s8 + $0xc0] sm:$0xf]  ;;  %v388_v30 = vunpack.c.l.bf16 %v372_v21 }
  0x28   : > { %v711_v16 = vsel %vm408_vm2, %v709_v6, %v710_v7  ;;  %v2350_v27 = vld [vmem:[%s3039_s8 + $0xc4] sm:$0x1]  ;;  %v2351_v28 = vld [vmem:[%s3039_s8 + $0xc8] sm:$0xf]  ;;  %v2352_v29 = vld [vmem:[%s3039_s8 + $0xcc] sm:$0x1]  ;;  %v389_v31 = vunpack.c.l.bf16 %v373_v23  ;;  %v390_v32 = vunpack.c.l.bf16 %v374_v24  ;;  %v391_v33 = vunpack.c.l.bf16 %v375_v25 }
  0x29   : > { %v714_v17 = vsel %vm408_vm2, %v712_v8, %v713_v9  ;;  %v677_v34 = vunpack.c.l.bf16 %v2349_v26  ;;  %v678_v35 = vunpack.c.l.bf16 %v2350_v27  ;;  %v679_v36 = vunpack.c.l.bf16 %v2351_v28  ;;  %v2867_v49 = vld [vmem:[%s3039_s8 + $0xc4] sm:$0xf0]  ;;  %v2871_v51 = vld [vmem:[%s3039_s8 + $0x10c] sm:$0xf0]  ;;  %v2417_v59 = vld [vmem:[%s3039_s8 + $0xc] sm:$0x1] }
  0x2a   : > { %v731_v22 = vpack.c.bf16 %v714_v17, %v711_v16  ;;  %v680_v37 = vunpack.c.l.bf16 %v2352_v29  ;;  %v427_v38 = vrot.slane %v388_v30, 1  ;;  %v428_v39 = vrot.slane %v389_v31, 1  ;;  %v2416_v58 = vld [vmem:[%s3039_s8 + $0x8] sm:$0xf]  ;;  %v2418_v60 = vld [vmem:[%s3039_s8 + $0x10] sm:$0xf] }
  0x2b   : > { %v430_v40 = vrot.slane %v390_v32, 1  ;;  %v431_v41 = vrot.slane %v391_v33, 1  ;;  %v715_v42 = vrot.slane %v677_v34, 1  ;;  %v716_v43 = vrot.slane %v678_v35, 1  ;;  %v2419_v61 = vld [vmem:[%s3039_s8 + $0x14] sm:$0x1] }
  0x2c   : > { %v718_v44 = vrot.slane %v679_v36, 1  ;;  %v719_v45 = vrot.slane %v680_v37, 1  ;;  %v953_v62 = vunpack.c.l.bf16 %v2416_v58  ;;  %v954_v63 = vunpack.c.l.bf16 %v2417_v59  ;;  %v2368_v6 = vld [vmem:[%s3039_s8 + $0x8] sm:$0xf]  ;;  %v2872_v7 = vld [vmem:[%s3039_s8 + $0xc] sm:$0xf0] }
  0x2d   : > { %v717_v52 = vsel %vm408_vm2, %v715_v42, %v716_v43  ;;  %v955_v0 = vunpack.c.l.bf16 %v2418_v60  ;;  %v956_v1 = vunpack.c.l.bf16 %v2419_v61  ;;  %v2397_v8 = vld [vmem:[%s3039_s8 + $0x50] sm:$0xf]  ;;  %v2876_v9 = vld [vmem:[%s3039_s8 + $0x54] sm:$0xf0]  ;;  %v2421_v16 = vld [vmem:[%s3039_s8 + $0x1c] sm:$0x1] }
  0x2e   : > { %v720_v53 = vsel %vm408_vm2, %v718_v44, %v719_v45  ;;  %v2422_v17 = vld [vmem:[%s3039_s8 + $0x20] sm:$0xf]  ;;  %v2372_v27 = vld [vmem:[%s3039_s8 + $0x18] sm:$0xf]  ;;  %v2877_v30 = vld [vmem:[%s3039_s8 + $0x64] sm:$0xf0] }
  0x2f   : > { %v732_v57 = vpack.c.bf16 %v720_v53, %v717_v52  ;;  %v959_v21 = vunpack.c.l.bf16 %v2422_v17  ;;  %v2873_v28 = vld [vmem:[%s3039_s8 + $0x1c] sm:$0xf0]  ;;  %v2424_v36 = vld [vmem:[%s3039_s8 + $0x28] sm:$0xf]  ;;  %v2425_v37 = vld [vmem:[%s3039_s8 + $0x2c] sm:$0x1] }
  0x30   : > { %v2401_v29 = vld [vmem:[%s3039_s8 + $0x60] sm:$0xf]  ;;  %v2373_v33 = vor.u32 %v2873_v28, %v2372_v27  ;;  %v2428_v58 = vld [vmem:[%s3039_s8 + $0x38] sm:$0xf]  ;;  %v2429_v59 = vld [vmem:[%s3039_s8 + $0x3c] sm:$0x1] }
  0x31   : > { %v994_v25 = vrot.slane %v959_v21, 1  ;;  %v2402_v34 = vor.u32 %v2877_v30, %v2401_v29  ;;  %v2430_v60 = vld [vmem:[%s3039_s8 + $0x40] sm:$0xf]  ;;  %v2431_v61 = vld [vmem:[%s3039_s8 + $0x44] sm:$0x1]  ;;  %v2894_v30 = vld [vmem:[%s3746_s3 + $0x70] sm:$0xff] }
  0x33   : > { %2275 = vmatmul.msk.bf16.vlgmr.msrb.gmra.mxu2 %vm270_vm1, %v441_v10  ;;  %v423_v10 = vsel %vm408_vm2, %v421_v2, %v422_v3  ;;  %v985_v2 = vrot.slane %v953_v62, 1  ;;  %v986_v3 = vrot.slane %v954_v63, 1  ;;  %v965_v62 = vunpack.c.l.bf16 %v2428_v58 }
  0x34   : > { %2304 = vmatmul.msk.bf16.vlgmr.msrb.gmra.mxu3 %vm270_vm1, %v2290_v11  ;;  %v426_v11 = vsel %vm408_vm2, %v424_v4, %v425_v5  ;;  %v988_v4 = vrot.slane %v955_v0, 1  ;;  %v989_v5 = vrot.slane %v956_v1, 1  ;;  %v966_v63 = vunpack.c.l.bf16 %v2429_v59 }
  0x35   : > { %2333 = vmatmul.msk.bf16.vlgmr.msrb.gmra.mxu0 %vm270_vm1, %v2319_v12  ;;  %v2297_v12 = vld [vmem:[%s3039_s8 + $0xb0] sm:$0xf]  ;;  %v443_v18 = vpack.c.bf16 %v426_v11, %v423_v10  ;;  %v987_v10 = vsel %vm408_vm2, %v985_v2, %v986_v3  ;;  %v967_v0 = vunpack.c.l.bf16 %v2430_v60  ;;  %v968_v1 = vunpack.c.l.bf16 %v2431_v61  ;;  %v2884_v60 = vld [vmem:[%s3746_s3 + $0x20] sm:$0xff] }
  0x36   : > { %2354 = vmatmul.msk.bf16.vlgmr.msrb.gmra.mxu1 %vm270_vm1, %v729_v14  ;;  %v2326_v14 = vld [vmem:[%s3039_s8 + $0xf8] sm:$0xf]  ;;  %v2298_v19 = vor.u32 %v2866_v13, %v2297_v12  ;;  %v990_v11 = vsel %vm408_vm2, %v988_v4, %v989_v5  ;;  %v2369_v12 = vor.u32 %v2872_v7, %v2368_v6  ;;  %v2398_v13 = vor.u32 %v2876_v9, %v2397_v8  ;;  %v2900_v61 = vld [vmem:[%s3746_s3 + $0xa0] sm:$0xff] }
  0x37   : > { %v2327_v20 = vor.u32 %v2870_v15, %v2326_v14  ;;  %v1017_v14 = vpack.c.bf16 %v990_v11, %v987_v10  ;;  %v2420_v15 = vld [vmem:[%s3039_s8 + $0x18] sm:$0xf]  ;;  %v1003_v6 = vrot.slane %v965_v62, 1  ;;  %v1004_v7 = vrot.slane %v966_v63, 1  ;;  %v2875_v11 = vld [vmem:[%s3039_s8 + $0x3c] sm:$0xf0] }
  0x38   : > { %v1006_v8 = vrot.slane %v967_v0, 1  ;;  %v1007_v9 = vrot.slane %v968_v1, 1  ;;  %v2380_v10 = vld [vmem:[%s3039_s8 + $0x38] sm:$0xf]  ;;  %v2910_v62 = vld [vmem:[%s3746_s3 + $0xf0] sm:$0xff]  ;;  %v2974_v0 = vmov 0.0  }
  0x39   : > { %1097 = vst [vmem:[#allocation2 + $0x10] sm:$0xff] %v2974_v0  ;;  %v2889_v1 = vld [vmem:[%s3746_s3 + $0x48] sm:$0xff] }
  0x3a   : > { %1098 = vst [vmem:[#allocation2 + $0x18] sm:$0x3] %v2974_v0 }
  0x3b   : > { %1095 = vst [vmem:[#allocation2] sm:$0xff] %v2974_v0 }
  0x3c   : > { %1096 = vst [vmem:[#allocation2 + $0x8] sm:$0x3] %v2974_v0 }
  0x3d   : > { %1099 = vst [vmem:[#allocation2 + $0x20] sm:$0xff] %v2974_v0 }
  0x3e   : > { %1100 = vst [vmem:[#allocation2 + $0x28] sm:$0x3] %v2974_v0 }
  0x3f   : > { %1101 = vst [vmem:[#allocation2 + $0x30] sm:$0xff] %v2974_v0 }
  0x40   : > { %1102 = vst [vmem:[#allocation2 + $0x38] sm:$0x3] %v2974_v0 }
  0x41   : > { %1103 = vst [vmem:[#allocation2 + $0x40] sm:$0xff] %v2974_v0 }
  0x42   : > { %1104 = vst [vmem:[#allocation2 + $0x48] sm:$0x3] %v2974_v0 }
  0x43   : > { %2276 = vmatmul.msk.bf16.gmra.mxu2 %vm270_vm1, %v442_v46  ;;  %v429_v46 = vsel %vm408_vm2, %v427_v38, %v428_v39  ;;  %v2426_v38 = vld [vmem:[%s3039_s8 + $0x30] sm:$0xf]  ;;  %v2427_v39 = vld [vmem:[%s3039_s8 + $0x34] sm:$0x1]  ;;  %1105 = vst [vmem:[#allocation2 + $0x50] sm:$0xff] %v2974_v0 }
  0x44   : > { %2305 = vmatmul.msk.bf16.gmra.mxu3 %vm270_vm1, %v2294_v47  ;;  %v432_v47 = vsel %vm408_vm2, %v430_v40, %v431_v41  ;;  %v961_v40 = vunpack.c.l.bf16 %v2424_v36  ;;  %v962_v41 = vunpack.c.l.bf16 %v2425_v37  ;;  %v963_v42 = vunpack.c.l.bf16 %v2426_v38  ;;  %1106 = vst [vmem:[#allocation2 + $0x58] sm:$0x3] %v2974_v0 }
  0x45   : > { %2334 = vmatmul.msk.bf16.gmra.mxu0 %vm270_vm1, %v2323_v48  ;;  %v2301_v48 = vld [vmem:[%s3039_s8 + $0xc0] sm:$0xf]  ;;  %v444_v54 = vpack.c.bf16 %v432_v47, %v429_v46  ;;  %v964_v43 = vunpack.c.l.bf16 %v2427_v39  ;;  %1107 = vst [vmem:[#allocation2 + $0x60] sm:$0xff] %v2974_v0 }
  0x46   : > { %2355 = vmatmul.msk.bf16.gmra.mxu1 %vm270_vm1, %v730_v50  ;;  %v2330_v50 = vld [vmem:[%s3039_s8 + $0x108] sm:$0xf]  ;;  %v2302_v55 = vor.u32 %v2867_v49, %v2301_v48  ;;  %v997_v44 = vrot.slane %v961_v40, 1  ;;  %v998_v45 = vrot.slane %v962_v41, 1  ;;  %v1000_v46 = vrot.slane %v963_v42, 1  ;;  %v2892_v39 = vld [vmem:[%s3746_s3 + $0x60] sm:$0xff] }
  0x47   : > { %v2331_v56 = vor.u32 %v2871_v51, %v2330_v50  ;;  %v1001_v47 = vrot.slane %v964_v43, 1  ;;  %v2376_v48 = vld [vmem:[%s3039_s8 + $0x28] sm:$0xf]  ;;  %v2874_v49 = vld [vmem:[%s3039_s8 + $0x2c] sm:$0xf0]  ;;  %1109 = vst [vmem:[#allocation2 + $0x70] sm:$0xff] %v2974_v0 }
  0x48   : > { %v2405_v50 = vld [vmem:[%s3039_s8 + $0x70] sm:$0xf]  ;;  %v2878_v51 = vld [vmem:[%s3039_s8 + $0x74] sm:$0xf0]  ;;  %v999_v52 = vsel %vm408_vm2, %v997_v44, %v998_v45  ;;  %1108 = vst [vmem:[#allocation2 + $0x68] sm:$0x3] %v2974_v0 }
  0x49   : > { %v1002_v53 = vsel %vm408_vm2, %v1000_v46, %v1001_v47  ;;  %v2891_v44 = vld [vmem:[%s3746_s3 + $0x58] sm:$0xff]  ;;  %1110 = vst [vmem:[#allocation2 + $0x78] sm:$0x3] %v2974_v0 }
  0x4a   : > { %v2887_v45 = vld [vmem:[%s3746_s3 + $0x38] sm:$0xff]  ;;  %1111 = vst [vmem:[#allocation2 + $0x80] sm:$0xff] %v2974_v0 }
  0x4b   : > { %v2903_v46 = vld [vmem:[%s3746_s3 + $0xb8] sm:$0xff]  ;;  %1306 = vmatpush.bf16.msrb.mxu2 %v2887_v45  ;;  %1112 = vst [vmem:[#allocation2 + $0x88] sm:$0x3] %v2974_v0 }
  0x4c   : > { %1412 = vmatpush.bf16.msrb.mxu3 %v2903_v46  ;;  %1113 = vst [vmem:[#allocation2 + $0x90] sm:$0xff] %v2974_v0 }
  0x4d   : > { %1114 = vst [vmem:[#allocation2 + $0x98] sm:$0x3] %v2974_v0 }
  0x53   : > { %2277 = vmatmul.msk.bf16.gmra.mxu2 %vm270_vm1, %v443_v18  ;;  %v2423_v18 = vld [vmem:[%s3039_s8 + $0x24] sm:$0x1] }
  0x54   : > { %2306 = vmatmul.msk.bf16.gmra.mxu3 %vm270_vm1, %v2298_v19  ;;  %v957_v19 = vunpack.c.l.bf16 %v2420_v15  ;;  %v1008_v15 = vsel %vm408_vm2, %v1006_v8, %v1007_v9 }
  0x55   : > { %2335 = vmatmul.msk.bf16.gmra.mxu0 %vm270_vm1, %v2327_v20  ;;  %v958_v20 = vunpack.c.l.bf16 %v2421_v16 }
  0x56   : > { %2356 = vmatmul.msk.bf16.gmra.mxu1 %vm270_vm1, %v731_v22  ;;  %v960_v22 = vunpack.c.l.bf16 %v2423_v18  ;;  %v991_v23 = vrot.slane %v957_v19, 1  ;;  %v2381_v18 = vor.u32 %v2875_v11, %v2380_v10  ;;  %v2882_v10 = vld [vmem:[%s3746_s3 + $0x10] sm:$0xff] }
  0x57   : > { %v992_v24 = vrot.slane %v958_v20, 1  ;;  %v2898_v11 = vld [vmem:[%s3746_s3 + $0x90] sm:$0xff] }
  0x58   : > { %v995_v26 = vrot.slane %v960_v22, 1 }
  0x59   : > { %v993_v31 = vsel %vm408_vm2, %v991_v23, %v992_v24 }
  0x5a   : > { %v996_v32 = vsel %vm408_vm2, %v994_v25, %v995_v26  ;;  %v2895_v26 = vld [vmem:[%s3746_s3 + $0x78] sm:$0xff] }
  0x5b   : > { %v1018_v35 = vpack.c.bf16 %v996_v32, %v993_v31  ;;  %1229 = vmatpush.bf16.msra.mxu1 %v2895_v26 }
  0x5f   : > { %1230 = vmatpush.bf16.msra.mxu1 %v2894_v30  ;;  %v2880_v30 = vld [vmem:[%s3746_s3] sm:$0xff] }
  0x63   : > { %2278 = vmatmul.msk.bf16.gmra.mxu2 %vm270_vm1, %v444_v54  ;;  %v2377_v54 = vor.u32 %v2874_v49, %v2376_v48  ;;  %v2886_v49 = vld [vmem:[%s3746_s3 + $0x30] sm:$0xff] }
  0x64   : > { %2307 = vmatmul.msk.bf16.gmra.mxu3 %vm270_vm1, %v2302_v55  ;;  %v2406_v55 = vor.u32 %v2878_v51, %v2405_v50  ;;  %v2902_v50 = vld [vmem:[%s3746_s3 + $0xb0] sm:$0xff]  ;;  %1307 = vmatpush.bf16.msrb.mxu2 %v2886_v49 }
  0x65   : > { %2336 = vmatmul.msk.bf16.gmra.mxu0 %vm270_vm1, %v2331_v56  ;;  %v1019_v56 = vpack.c.bf16 %v1002_v53, %v999_v52  ;;  %1413 = vmatpush.bf16.msrb.mxu3 %v2902_v50  ;;  %v2890_v52 = vld [vmem:[%s3746_s3 + $0x50] sm:$0xff] }
  0x66   : > { %2357 = vmatmul.msk.bf16.gmra.mxu1 %vm270_vm1, %v732_v57 }
  0x73   : > { %2383 = vmatmul.msk.bf16.vlgmr.msra.gmra.mxu2 %vm270_vm1, %v2369_v12  ;;  %v2409_v12 = vld [vmem:[%s3039_s8 + $0x80] sm:$0xf] }
  0x74   : > { %2412 = vmatmul.msk.bf16.vlgmr.msra.gmra.mxu3 %vm270_vm1, %v2398_v13  ;;  %v2879_v13 = vld [vmem:[%s3039_s8 + $0x84] sm:$0xf0] }
  0x75   : > { %2433 = vmatmul.msk.bf16.vlgmr.msra.gmra.mxu0 %vm270_vm1, %v1017_v14  ;;  %v1005_v14 = vsel %vm408_vm2, %v1003_v6, %v1004_v7  ;;  %v2410_v19 = vor.u32 %v2879_v13, %v2409_v12  ;;  %v2899_v6 = vld [vmem:[%s3746_s3 + $0x98] sm:$0xff]  ;;  %v2909_v7 = vld [vmem:[%s3746_s3 + $0xe8] sm:$0xff]  ;;  %v2908_v12 = vld [vmem:[%s3746_s3 + $0xe0] sm:$0xff] }
  0x76   : > { %v1020_v20 = vpack.c.bf16 %v1008_v15, %v1005_v14  ;;  %v2888_v13 = vld [vmem:[%s3746_s3 + $0x40] sm:$0xff]  ;;  %v2881_v15 = vld [vmem:[%s3746_s3 + $0x8] sm:$0xff] }
  0x83   : > { %2384 = vmatmul.msk.bf16.gmra.mxu2 %vm270_vm1, %v2373_v33 }
  0x84   : > { %2413 = vmatmul.msk.bf16.gmra.mxu3 %vm270_vm1, %v2402_v34  ;;  %v2893_v34 = vld [vmem:[%s3746_s3 + $0x68] sm:$0xff] }
  0x85   : > { %2434 = vmatmul.msk.bf16.gmra.mxu0 %vm270_vm1, %v1018_v35  ;;  %1231 = vmatpush.bf16.msra.mxu1 %v2893_v34  ;;  %v2896_v34 = vld [vmem:[%s3746_s3 + $0x80] sm:$0xff] }
  0x89   : > { %1232 = vmatpush.bf16.msra.mxu1 %v2892_v39  ;;  %v2906_v39 = vld [vmem:[%s3746_s3 + $0xd0] sm:$0xff] }
  0x8d   : > { %1233 = vmatpush.bf16.msra.mxu1 %v2891_v44  ;;  %v2905_v44 = vld [vmem:[%s3746_s3 + $0xc8] sm:$0xff] }
  0x91   : > { %1234 = vmatpush.bf16.msra.mxu1 %v2890_v52  ;;  %v2904_v52 = vld [vmem:[%s3746_s3 + $0xc0] sm:$0xff] }
  0x92   : > { %v3197_v57 = vpop.f32.mrf.mxu0 }
  0x93   : > { %2385 = vmatmul.msk.bf16.gmra.mxu2 %vm270_vm1, %v2377_v54  ;;  %v3250_v35 = vpop.f32.mrf.mxu1  ;;  %v2885_v54 = vld [vmem:[%s3746_s3 + $0x28] sm:$0xff] }
  0x94   : > { %2414 = vmatmul.msk.bf16.gmra.mxu3 %vm270_vm1, %v2406_v55  ;;  %v2901_v55 = vld [vmem:[%s3746_s3 + $0xa8] sm:$0xff]  ;;  %1308 = vmatpush.bf16.msrb.mxu2 %v2885_v54 }
  0x95   : > { %2435 = vmatmul.msk.bf16.gmra.mxu0 %vm270_vm1, %v1019_v56  ;;  %v2911_v56 = vld [vmem:[%s3746_s3 + $0xf8] sm:$0xff]  ;;  %1414 = vmatpush.bf16.msrb.mxu3 %v2901_v55 }
  0x96   : > { %v306_v2 = vpop.f32.mrf.mxu2  ;;  %1526 = vmatpush.bf16.msrb.mxu0 %v2911_v56  ;;  %1235 = vmatpush.bf16.msra.mxu1 %v2889_v1  ;;  %v2919_v56 = vld [vmem:[%s3746_s3 + $0x138] sm:$0xff] }
  0x97   : > { %v350_v3 = vpop.f32.mrf.mxu3 }
  0x98   : > { %v3206_v4 = vadd.f32 %v350_v3, %v306_v2  ;;  %1309 = vmatpush.bf16.msrb.mxu2 %v2884_v60  ;;  %v2883_v2 = vld [vmem:[%s3746_s3 + $0x18] sm:$0xff] }
  0x99   : > { %1415 = vmatpush.bf16.msrb.mxu3 %v2900_v61 }
  0x9a   : > { %v3208_v5 = vpop.f32.mrf.mxu0  ;;  %1527 = vmatpush.bf16.msrb.mxu0 %v2910_v62  ;;  %1236 = vmatpush.bf16.msra.mxu1 %v2888_v13 }
  0x9b   : > { %v3265_v42 = vpop.f32.mrf.mxu1 }
  0x9c   : > { %1310 = vmatpush.bf16.msrb.mxu2 %v2883_v2  ;;  %v343_v49 = vadd.f32 %v3265_v42, %v3208_v5 }
  0x9d   : > { %1416 = vmatpush.bf16.msrb.mxu3 %v2899_v6 }
  0x9e   : > { %v3216_v16 = vpop.f32.mrf.mxu2  ;;  %1528 = vmatpush.bf16.msrb.mxu0 %v2909_v7  ;;  %1640 = vmatpush.bf16.msrb.mxu1 %v2919_v56  ;;  %v3424_v7 = vld [vmem:[%s3745_s2] ss:$0 sm:$0xff] }
  0x9f   : > { %v3218_v17 = vpop.f32.mrf.mxu3 }
  0xa0   : > { %1311 = vmatpush.bf16.msrb.mxu2 %v2882_v10 }
  0xa1   : > { %1417 = vmatpush.bf16.msrb.mxu3 %v2898_v11 }
  0xa2   : > { %v3220_v21 = vpop.f32.mrf.mxu0  ;;  %1529 = vmatpush.bf16.msrb.mxu0 %v2908_v12 }
  0xa3   : > { %2386 = vmatmul.msk.bf16.gmra.mxu2 %vm270_vm1, %v2381_v18  ;;  %v3293_v53 = vpop.f32.mrf.mxu1  ;;  %v2897_v18 = vld [vmem:[%s3746_s3 + $0x88] sm:$0xff] }
  0xa4   : > { %2415 = vmatmul.msk.bf16.gmra.mxu3 %vm270_vm1, %v2410_v19  ;;  %v2907_v19 = vld [vmem:[%s3746_s3 + $0xd8] sm:$0xff]  ;;  %1312 = vmatpush.bf16.msrb.mxu2 %v2881_v15  ;;  %v346_v61 = vadd.f32 %v3293_v53, %v3220_v21 }
  0xa5   : > { %2436 = vmatmul.msk.bf16.gmra.mxu0 %vm270_vm1, %v1020_v20  ;;  %1418 = vmatpush.bf16.msrb.mxu3 %v2897_v18 }
  0xa6   : > { %v311_v22 = vpop.f32.mrf.mxu2  ;;  %1530 = vmatpush.bf16.msrb.mxu0 %v2907_v19 }
  0xa7   : > { %v355_v23 = vpop.f32.mrf.mxu3 }
  0xa8   : > { %v3225_v24 = vadd.f32 %v355_v23, %v311_v22  ;;  %v341_v23 = vadd.f32 %v3250_v35, %v3197_v57  ;;  %1313 = vmatpush.bf16.msrb.mxu2 %v2880_v30 }
  0xa9   : > { %1419 = vmatpush.bf16.msrb.mxu3 %v2896_v34 }
  0xaa   : > { %v3227_v25 = vpop.f32.mrf.mxu0  ;;  %1531 = vmatpush.bf16.msrb.mxu0 %v2906_v39  ;;  %v2917_v39 = vld [vmem:[%s3746_s3 + $0x128] sm:$0xff] }
  0xab   : > { %v3327_v3 = vpop.f32.mrf.mxu1 }
  0xac   : > { %v348_v13 = vadd.f32 %v3327_v3, %v3227_v25 }
  0xae   : > { %v3232_v27 = vpop.f32.mrf.mxu2  ;;  %1532 = vmatpush.bf16.msrb.mxu0 %v2905_v44 }
  0xaf   : > { %v3234_v28 = vpop.f32.mrf.mxu3 }
  0xb2   : > { %v3236_v29 = vpop.f32.mrf.mxu0  ;;  %1533 = vmatpush.bf16.msrb.mxu0 %v2904_v52 }
  0xb3   : > { %v759_v20 = vpop.f32.mrf.mxu1 }
  0xb6   : > { %v3241_v31 = vpop.f32.mrf.mxu2 }
  0xb7   : > { %v3243_v32 = vpop.f32.mrf.mxu3  ;;  %v491_v57 = vadd.f32 %v3241_v31, %v341_v23 }
  0xb9   : > { %v566_v45 = vadd.f32 %v3243_v32, %v491_v57 }
  0xba   : > { %v3245_v33 = vpop.f32.mrf.mxu0 }
  0xbb   : > { %v761_v31 = vpop.f32.mrf.mxu1  ;;  %v641_v54 = vadd.f32 %v3236_v29, %v566_v45  ;;  %v1335_v45 = vld [vmem:[#allocation2 + $0x2] sm:$0xff] }
  0xbd   : > { %v779_v60 = vadd.f32 %v759_v20, %v641_v54 }
  0xbe   : > { %v3252_v36 = vpop.f32.mrf.mxu2 }
  0xbf   : > { %v3254_v37 = vpop.f32.mrf.mxu3  ;;  %v492_v55 = vadd.f32 %v3252_v36, %v343_v49 }
  0xc1   : > { %v567_v5 = vadd.f32 %v3254_v37, %v492_v55  ;;  %v2918_v37 = vld [vmem:[%s3746_s3 + $0x130] sm:$0xff] }
  0xc2   : > { %v3256_v38 = vpop.f32.mrf.mxu0  ;;  %1641 = vmatpush.bf16.msrb.mxu1 %v2918_v37 }
  0xc3   : > { %v764_v2 = vpop.f32.mrf.mxu1  ;;  %v642_v29 = vadd.f32 %v3245_v33, %v567_v5 }
  0xc5   : > { %v780_v21 = vadd.f32 %v761_v31, %v642_v29  ;;  %v353_v29 = vadd.f32 %v3218_v17, %v3216_v16 }
  0xc6   : > { %v3261_v40 = vpop.f32.mrf.mxu2  ;;  %1642 = vmatpush.bf16.msrb.mxu1 %v2917_v39 }
  0xc7   : > { %v3263_v41 = vpop.f32.mrf.mxu3  ;;  %v493_v36 = vadd.f32 %v3261_v40, %v346_v61  ;;  %v1152_v40 = vld [vmem:[#allocation2 + $0x1] sm:$0xff] }
  0xc9   : > { %v568_v53 = vadd.f32 %v3263_v41, %v493_v36 }
  0xca   : > { %v3267_v43 = vpop.f32.mrf.mxu0 }
  0xcb   : > { %v643_v20 = vadd.f32 %v3256_v38, %v568_v53  ;;  %v766_v57 = vpop.f32.mrf.mxu1 }
  0xcd   : > { %v781_v3 = vadd.f32 %v764_v2, %v643_v20 }
  0xce   : > { %v3278_v47 = vpop.f32.mrf.mxu2 }
  0xcf   : > { %v3280_v48 = vpop.f32.mrf.mxu3  ;;  %v494_v23 = vadd.f32 %v3278_v47, %v348_v13 }
  0xd1   : > { %v569_v44 = vadd.f32 %v3280_v48, %v494_v23 }
  0xd2   : > { %v3288_v51 = vpop.f32.mrf.mxu0 }
  0xd3   : > { %v644_v56 = vadd.f32 %v3267_v43, %v569_v44  ;;  %v2935_v43 = vld [vmem:[%s3746_s3 + $0x1b8] sm:$0xff]  ;;  %v2924_v44 = vld [vmem:[%s3746_s3 + $0x160] sm:$0xff] }
  0xd4   : > { %1869 = vmatpush.bf16.msra.mxu3 %v2935_v43  ;;  %v358_v43 = vadd.f32 %v3234_v28, %v3232_v27  ;;  %v2912_v27 = vld [vmem:[%s3746_s3 + $0x100] sm:$0xff] }
  0xd6   : > { %v3304_v58 = vpop.f32.mrf.mxu2 }
  0xd7   : > { %v3306_v59 = vpop.f32.mrf.mxu3  ;;  %v495_v54 = vadd.f32 %v3304_v58, %v3206_v4  ;;  %v2927_v4 = vld [vmem:[%s3746_s3 + $0x178] sm:$0xff] }
  0xd8   : > { %1754 = vmatpush.bf16.msra.mxu2 %v2927_v4  ;;  %v2922_v4 = vld [vmem:[%s3746_s3 + $0x150] sm:$0xff] }
  0xd9   : > { %v570_v58 = vadd.f32 %v3306_v59, %v495_v54  ;;  %v2934_v59 = vld [vmem:[%s3746_s3 + $0x1b0] sm:$0xff] }
  0xda   : > { %v3317_v63 = vpop.f32.mrf.mxu0  ;;  %1870 = vmatpush.bf16.msra.mxu3 %v2934_v59  ;;  %v2942_v54 = vld [vmem:[%s3746_s3 + $0x1f0] sm:$0xff] }
  0xde   : > { %v3337_v8 = vpop.f32.mrf.mxu2 }
  0xdf   : > { %v3340_v9 = vpop.f32.mrf.mxu3  ;;  %v496_v53 = vadd.f32 %v3337_v8, %v353_v29  ;;  %v2933_v8 = vld [vmem:[%s3746_s3 + $0x1a8] sm:$0xff] }
  0xe0   : > { %1871 = vmatpush.bf16.msra.mxu3 %v2933_v8 }
  0xe2   : > { %v3356_v14 = vpop.f32.mrf.mxu0 }
  0xe6   : > { %v3372_v22 = vpop.f32.mrf.mxu2 }
  0xe7   : > { %v3377_v26 = vpop.f32.mrf.mxu3 }
  0xea   : > { %v3391_v35 = vpop.f32.mrf.mxu0 }
  0xee   : > { %v3402_v46 = vpop.f32.mrf.mxu2 }
  0xef   : > { %v3406_v50 = vpop.f32.mrf.mxu3 }
  0xf2   : > { %v1047_v32 = vpop.f32.mrf.mxu0 }
  0xf6   : > { %v834_v42 = vpop.f32.mrf.mxu2 }
  0xf7   : > { %v854_v62 = vadd.f32 %v834_v42, %v779_v60  ;;  %v909_v1 = vpop.f32.mrf.mxu3  ;;  %v2916_v42 = vld [vmem:[%s3746_s3 + $0x120] sm:$0xff] }
  0xf8   : > { %1643 = vmatpush.bf16.msrb.mxu1 %v2916_v42  ;;  %v2941_v42 = vld [vmem:[%s3746_s3 + $0x1e8] sm:$0xff] }
  0xf9   : > { %v929_v6 = vadd.f32 %v909_v1, %v854_v62  ;;  %v782_v1 = vadd.f32 %v766_v57, %v644_v56 }
  0xfa   : > { %v1049_v10 = vpop.f32.mrf.mxu0 }
  0xfb   : > { %v1067_v11 = vadd.f32 %v1047_v32, %v929_v6 }
  0xfd   : > { %v1079_v33 = vadd.f32 %v3424_v7, %v1067_v11  ;;  %v2926_v11 = vld [vmem:[%s3746_s3 + $0x170] sm:$0xff] }
  0xfe   : > { %v836_v12 = vpop.f32.mrf.mxu2  ;;  %1755 = vmatpush.bf16.msra.mxu2 %v2926_v11 }
  0xff   : > { %v3433_v15 = vmax.f32 %v1079_v33, 0.0  ;;  %v855_v18 = vadd.f32 %v836_v12, %v780_v21  ;;  %v911_v19 = vpop.f32.mrf.mxu3  ;;  %v645_v21 = vadd.f32 %v3288_v51, %v570_v58  ;;  %v2925_v51 = vld [vmem:[%s3746_s3 + $0x168] sm:$0xff] }
 0x101   : > { %1116 = vst [vmem:[#allocation2 + $0x11] sm:$0xff] %v3433_v15  ;;  %v930_v30 = vadd.f32 %v911_v19, %v855_v18  ;;  %v1160_v41 = vpack.c.bf16 %v3433_v15, %v1152_v40  ;;  %v2915_v40 = vld [vmem:[%s3746_s3 + $0x118] sm:$0xff]  ;;  %v571_v19 = vadd.f32 %v3340_v9, %v496_v53  ;;  %v2914_v9 = vld [vmem:[%s3746_s3 + $0x110] sm:$0xff] }
 0x102   : > { %v1052_v34 = vpop.f32.mrf.mxu0  ;;  %v2943_v18 = vld [vmem:[%s3746_s3 + $0x1f8] sm:$0xff]  ;;  %1644 = vmatpush.bf16.msrb.mxu1 %v2915_v40  ;;  %1756 = vmatpush.bf16.msra.mxu2 %v2925_v51  ;;  %v2920_v51 = vld [vmem:[%s3746_s3 + $0x140] sm:$0xff] }
 0x103   : > { %v1068_v25 = vadd.f32 %v1049_v10, %v930_v30  ;;  %1237 = vmatmul.bf16.vlgmr.msra.gmra.mxu1 %v1160_v41  ;;  %1983 = vmatpush.bf16.msra.mxu0 %v2943_v18  ;;  %v2928_v18 = vld [vmem:[%s3746_s3 + $0x180] sm:$0xff] }
 0x105   : > { %v1080_v38 = vadd.f32 %v3424_v7, %v1068_v25 }
 0x106   : > { %v839_v47 = vpop.f32.mrf.mxu2  ;;  %1645 = vmatpush.bf16.msrb.mxu1 %v2914_v9  ;;  %1757 = vmatpush.bf16.msra.mxu2 %v2924_v44 }
 0x107   : > { %v3444_v31 = vmax.f32 %v1080_v38, 0.0  ;;  %v856_v49 = vadd.f32 %v839_v47, %v781_v3  ;;  %v914_v52 = vpop.f32.mrf.mxu3  ;;  %v2932_v38 = vld [vmem:[%s3746_s3 + $0x1a0] sm:$0xff]  ;;  %v646_v47 = vadd.f32 %v3317_v63, %v571_v19  ;;  %1984 = vmatpush.bf16.msra.mxu0 %v2942_v54  ;;  %v2913_v63 = vld [vmem:[%s3746_s3 + $0x108] sm:$0xff]  ;;  %v2938_v19 = vld [vmem:[%s3746_s3 + $0x1d0] sm:$0xff] }
 0x108   : > { %v1125_v55 = vld [vmem:[#allocation2 + $0x10] sm:$0xff]  ;;  %1872 = vmatpush.bf16.msra.mxu3 %v2932_v38 }
 0x109   : > { %v3448_v32 = vld [vmem:[#allocation2 + $0x12] sm:$0xff]  ;;  %1117 = vst [vmem:[#allocation2 + $0x21] sm:$0xff] %v3444_v31  ;;  %v931_v60 = vadd.f32 %v914_v52, %v856_v49  ;;  %v1132_v48 = vpack.c.bf16 %v1125_v55, %v2974_v0  ;;  %v769_v0 = vpop.f32.mrf.mxu1 }
 0x10a   : > { %v1343_v5 = vpack.c.bf16 %v3448_v32, %v1335_v45  ;;  %v1054_v61 = vpop.f32.mrf.mxu0  ;;  %v783_v23 = vadd.f32 %v769_v0, %v645_v21  ;;  %v497_v45 = vadd.f32 %v3372_v22, %v3225_v24  ;;  %v2923_v22 = vld [vmem:[%s3746_s3 + $0x158] sm:$0xff]  ;;  %1646 = vmatpush.bf16.msrb.mxu1 %v2913_v63  ;;  %v2936_v63 = vld [vmem:[%s3746_s3 + $0x1c0] sm:$0xff] }
 0x10b   : > { %v1069_v62 = vadd.f32 %v1052_v34, %v931_v60  ;;  %1314 = vmatmul.bf16.vlgmr.msrb.gmra.mxu2 %v1132_v48  ;;  %v2931_v48 = vld [vmem:[%s3746_s3 + $0x198] sm:$0xff]  ;;  %1985 = vmatpush.bf16.msra.mxu0 %v2941_v42 }
 0x10c   : > { %1420 = vmatmul.bf16.vlgmr.msrb.gmra.mxu3 %v1343_v5  ;;  %v572_v5 = vadd.f32 %v3377_v26, %v497_v45  ;;  %1758 = vmatpush.bf16.msra.mxu2 %v2923_v22  ;;  %v2930_v26 = vld [vmem:[%s3746_s3 + $0x190] sm:$0xff] }
 0x10d   : > { %v1081_v2 = vadd.f32 %v3424_v7, %v1069_v62  ;;  %1873 = vmatpush.bf16.msra.mxu3 %v2931_v48 }
 0x10e   : > { %v841_v36 = vpop.f32.mrf.mxu2  ;;  %v647_v28 = vadd.f32 %v3356_v14, %v572_v5  ;;  %1647 = vmatpush.bf16.msrb.mxu1 %v2912_v27  ;;  %v2921_v14 = vld [vmem:[%s3746_s3 + $0x148] sm:$0xff] }
 0x10f   : > { %v3467_v6 = vmax.f32 %v1081_v2, 0.0  ;;  %v857_v10 = vadd.f32 %v841_v36, %v782_v1  ;;  %v916_v37 = vpop.f32.mrf.mxu3  ;;  %v2940_v1 = vld [vmem:[%s3746_s3 + $0x1e0] sm:$0xff] }
 0x110   : > { %v1450_v33 = vld [vmem:[#allocation2 + $0x20] sm:$0xff]  ;;  %1759 = vmatpush.bf16.msra.mxu2 %v2922_v4  ;;  %1986 = vmatpush.bf16.msra.mxu0 %v2940_v1 }
 0x111   : > { %1118 = vst [vmem:[#allocation2 + $0x31] sm:$0xff] %v3467_v6  ;;  %v932_v16 = vadd.f32 %v916_v37, %v857_v10  ;;  %v1457_v17 = vpack.c.bf16 %v1450_v33, %v1125_v55  ;;  %v3480_v12 = vpack.c.bf16 %v3467_v6, %v3444_v31  ;;  %v771_v34 = vpop.f32.mrf.mxu1  ;;  %v3497_v39 = vld [vmem:[#allocation2 + $0x22] sm:$0xff]  ;;  %v498_v37 = vadd.f32 %v3402_v46, %v358_v43 }
 0x112   : > { %v1057_v20 = vpop.f32.mrf.mxu0  ;;  %1874 = vmatpush.bf16.msra.mxu3 %v2930_v26  ;;  %v2929_v46 = vld [vmem:[%s3746_s3 + $0x188] sm:$0xff] }
 0x113   : > { %v1070_v13 = vadd.f32 %v1054_v61, %v932_v16  ;;  %1534 = vmatmul.bf16.vlgmr.msrb.gmra.mxu0 %v1457_v17  ;;  %1242 = vmatmul.bf16.gmra.mxu1 %v3480_v12  ;;  %v784_v61 = vadd.f32 %v771_v34, %v646_v47  ;;  %v2939_v16 = vld [vmem:[%s3746_s3 + $0x1d8] sm:$0xff]  ;;  %v573_v17 = vadd.f32 %v3406_v50, %v498_v37  ;;  %v2949_v37 = vld [vmem:[%s3746_s3 + $0x228] sm:$0xff] }
 0x114   : > { %1760 = vmatpush.bf16.msra.mxu2 %v2921_v14  ;;  %1987 = vmatpush.bf16.msra.mxu0 %v2939_v16  ;;  %v2947_v14 = vld [vmem:[%s3746_s3 + $0x218] sm:$0xff] }
 0x115   : > { %v1082_v30 = vadd.f32 %v3424_v7, %v1070_v13 }
 0x116   : > { %v844_v41 = vpop.f32.mrf.mxu2  ;;  %1875 = vmatpush.bf16.msra.mxu3 %v2929_v46 }
 0x117   : > { %v3499_v57 = vmax.f32 %v1082_v30, 0.0  ;;  %v858_v25 = vadd.f32 %v844_v41, %v783_v23  ;;  %v919_v3 = vpop.f32.mrf.mxu3  ;;  %v648_v30 = vadd.f32 %v3391_v35, %v573_v17  ;;  %v2951_v35 = vld [vmem:[%s3746_s3 + $0x238] sm:$0xff] }
 0x118   : > { %v1127_v49 = vld [vmem:[#allocation2 + $0x30] sm:$0xff]  ;;  %1761 = vmatpush.bf16.msra.mxu2 %v2920_v51  ;;  %1988 = vmatpush.bf16.msra.mxu0 %v2938_v19 }
 0x119   : > { %v3513_v52 = vld [vmem:[#allocation2 + $0x32] sm:$0xff]  ;;  %1119 = vst [vmem:[#allocation2 + $0x41] sm:$0xff] %v3499_v57  ;;  %v933_v55 = vadd.f32 %v919_v3, %v858_v25  ;;  %v3519_v56 = vpack.c.bf16 %v1127_v49, %v1450_v33  ;;  %v774_v10 = vpop.f32.mrf.mxu1  ;;  %2097 = vmatpush.bf16.msra.mxu1 %v2951_v35 }
 0x11a   : > { %v3523_v60 = vpack.c.bf16 %v3513_v52, %v3497_v39  ;;  %v1059_v58 = vpop.f32.mrf.mxu0  ;;  %v785_v40 = vadd.f32 %v774_v10, %v647_v28  ;;  %1876 = vmatpush.bf16.msra.mxu3 %v2928_v18  ;;  %v1913_v17 = vld [vmem:[#allocation2 + $0x91] sm:$0xff] }
 0x11b   : > { %v1071_v24 = vadd.f32 %v1057_v20, %v933_v55  ;;  %1319 = vmatmul.bf16.gmra.mxu2 %v3519_v56 }
 0x11c   : > { %1425 = vmatmul.bf16.gmra.mxu3 %v3523_v60 }
 0x11d   : > { %v1083_v62 = vadd.f32 %v3424_v7, %v1071_v24 }
 0x11e   : > { %v846_v0 = vpop.f32.mrf.mxu2 }
 0x11f   : > { %v3552_v2 = vmax.f32 %v1083_v62, 0.0  ;;  %v859_v29 = vadd.f32 %v846_v0, %v784_v61  ;;  %v921_v36 = vpop.f32.mrf.mxu3  ;;  %v2950_v0 = vld [vmem:[%s3746_s3 + $0x230] sm:$0xff] }
 0x120   : > { %v1452_v11 = vld [vmem:[#allocation2 + $0x40] sm:$0xff]  ;;  %2098 = vmatpush.bf16.msra.mxu1 %v2950_v0 }
 0x121   : > { %1120 = vst [vmem:[#allocation2 + $0x51] sm:$0xff] %v3552_v2  ;;  %v934_v59 = vadd.f32 %v921_v36, %v859_v29  ;;  %v1458_v21 = vpack.c.bf16 %v1452_v11, %v1127_v49  ;;  %v3562_v53 = vpack.c.bf16 %v3552_v2, %v3499_v57  ;;  %v3588_v25 = vld [vmem:[#allocation2 + $0x42] sm:$0xff]  ;;  %v776_v47 = vpop.f32.mrf.mxu1 }
 0x122   : > { %v1062_v34 = vpop.f32.mrf.mxu0  ;;  %v2937_v49 = vld [vmem:[%s3746_s3 + $0x1c8] sm:$0xff]  ;;  %v786_v54 = vadd.f32 %v776_v47, %v648_v30 }
 0x123   : > { %v1072_v33 = vadd.f32 %v1059_v58, %v934_v59  ;;  %1539 = vmatmul.bf16.gmra.mxu0 %v1458_v21  ;;  %1247 = vmatmul.bf16.gmra.mxu1 %v3562_v53  ;;  %v2948_v21 = vld [vmem:[%s3746_s3 + $0x220] sm:$0xff] }
 0x124   : > { %1989 = vmatpush.bf16.msra.mxu0 %v2937_v49  ;;  %2099 = vmatpush.bf16.msra.mxu1 %v2949_v37 }
 0x125   : > { %v1084_v13 = vadd.f32 %v3424_v7, %v1072_v33  ;;  %v1685_v33 = vpack.c.bf16 %v3497_v39, %v3448_v32  ;;  %v1686_v32 = vpack.c.bf16 %v3588_v25, %v3513_v52  ;;  %v2945_v39 = vld [vmem:[%s3746_s3 + $0x208] sm:$0xff] }
 0x126   : > { %v849_v8 = vpop.f32.mrf.mxu2 }
 0x127   : > { %v3585_v50 = vmax.f32 %v1084_v13, 0.0  ;;  %v860_v20 = vadd.f32 %v849_v8, %v785_v40  ;;  %v924_v23 = vpop.f32.mrf.mxu3 }
 0x128   : > { %v1129_v41 = vld [vmem:[#allocation2 + $0x50] sm:$0xff]  ;;  %1990 = vmatpush.bf16.msra.mxu0 %v2936_v63  ;;  %2100 = vmatpush.bf16.msra.mxu1 %v2948_v21 }
 0x129   : > { %v3590_v3 = vld [vmem:[#allocation2 + $0x52] sm:$0xff]  ;;  %1121 = vst [vmem:[#allocation2 + $0x61] sm:$0xff] %v3585_v50  ;;  %v935_v9 = vadd.f32 %v924_v23, %v860_v20  ;;  %v1134_v44 = vpack.c.bf16 %v1129_v41, %v1452_v11 }
 0x12a   : > { %v3595_v38 = vpack.c.bf16 %v3590_v3, %v3588_v25  ;;  %v1064_v43 = vpop.f32.mrf.mxu0  ;;  %v2027_v25 = vld [vmem:[#allocation2 + $0x92] sm:$0xff] }
 0x12b   : > { %v1073_v45 = vadd.f32 %v1062_v34, %v935_v9  ;;  %1324 = vmatmul.bf16.gmra.mxu2 %v1134_v44 }
 0x12c   : > { %1430 = vmatmul.bf16.gmra.mxu3 %v3595_v38  ;;  %2101 = vmatpush.bf16.msra.mxu1 %v2947_v14 }
 0x12d   : > { %v1085_v55 = vadd.f32 %v3424_v7, %v1073_v45 }
 0x12e   : > { %v851_v24 = vpop.f32.mrf.mxu2 }
 0x12f   : > { %v1093_v22 = vmax.f32 %v1085_v55, 0.0  ;;  %v861_v48 = vadd.f32 %v851_v24, %v786_v54  ;;  %v926_v5 = vpop.f32.mrf.mxu3 }
 0x130   : > { %v1454_v42 = vld [vmem:[#allocation2 + $0x60] sm:$0xff] }
 0x131   : > { %1122 = vst [vmem:[#allocation2 + $0x71] sm:$0xff] %v1093_v22  ;;  %v936_v61 = vadd.f32 %v926_v5, %v861_v48  ;;  %v1459_v62 = vpack.c.bf16 %v1454_v42, %v1129_v41  ;;  %v1163_v4 = vpack.c.bf16 %v1093_v22, %v3585_v50  ;;  %v1341_v36 = vld [vmem:[#allocation2 + $0x62] sm:$0xff] }
 0x133   : > { %v1074_v58 = vadd.f32 %v1064_v43, %v936_v61  ;;  %1544 = vmatmul.bf16.gmra.mxu0 %v1459_v62  ;;  %1252 = vmatmul.bf16.gmra.mxu1 %v1163_v4 }
 0x135   : > { %v1086_v26 = vadd.f32 %v3424_v7, %v1074_v58  ;;  %v1571_v7 = vpack.c.bf16 %v3444_v31, %v3433_v15  ;;  %v1572_v15 = vpack.c.bf16 %v3499_v57, %v3467_v6  ;;  %v2946_v31 = vld [vmem:[%s3746_s3 + $0x210] sm:$0xff]  ;;  %v2944_v6 = vld [vmem:[%s3746_s3 + $0x200] sm:$0xff]  ;;  %v1687_v57 = vpack.c.bf16 %v1341_v36, %v3590_v3 }
 0x136   : > { %2102 = vmatpush.bf16.msra.mxu1 %v2946_v31 }
 0x137   : > { %v1094_v1 = vmax.f32 %v1086_v26, 0.0 }
 0x138   : > { %v1131_v29 = vld [vmem:[#allocation2 + $0x70] sm:$0xff] }
 0x139   : > { %v1342_v27 = vld [vmem:[#allocation2 + $0x72] sm:$0xff]  ;;  %1123 = vst [vmem:[#allocation2 + $0x81] sm:$0xff] %v1094_v1  ;;  %v1135_v28 = vpack.c.bf16 %v1131_v29, %v1454_v42  ;;  %v1574_v52 = vpack.c.bf16 %v1094_v1, %v1093_v22  ;;  %v1917_v13 = vpack.c.bf16 %v1913_v17, %v1094_v1 }
 0x13a   : > { %v1346_v10 = vpack.c.bf16 %v1342_v27, %v1341_v36  ;;  %2103 = vmatpush.bf16.msra.mxu1 %v2945_v39 }
 0x13b   : > { %1329 = vmatmul.bf16.gmra.mxu2 %v1135_v28 }
 0x13c   : > { %1435 = vmatmul.bf16.gmra.mxu3 %v1346_v10 }
 0x13e   : > { %2104 = vmatpush.bf16.msra.mxu1 %v2944_v6 }
 0x140   : > { %v1456_v11 = vld [vmem:[#allocation2 + $0x80] sm:$0xff] }
 0x141   : > { %v1460_v59 = vpack.c.bf16 %v1456_v11, %v1131_v29  ;;  %v1803_v16 = vpack.c.bf16 0.0, %v1456_v11 }
 0x143   : > { %1549 = vmatmul.bf16.gmra.mxu0 %v1460_v59  ;;  %1648 = vmatmul.bf16.vlgmr.msrb.gmra.mxu1 %v1571_v7 }
 0x14b   : > { %1762 = vmatmul.bf16.vlgmr.msra.gmra.mxu2 %v1685_v33 }
 0x14c   : > { %1877 = vmatmul.bf16.vlgmr.msra.gmra.mxu3 %v3519_v56  ;;  %v1684_v56 = vld [vmem:[#allocation2 + $0x82] sm:$0xff] }
 0x14d   : > { %v1688_v46 = vpack.c.bf16 %v1684_v56, %v1342_v27  ;;  %v2031_v9 = vpack.c.bf16 %v2027_v25, %v1684_v56 }
 0x153   : > { %1991 = vmatmul.bf16.vlgmr.msra.gmra.mxu0 %v3480_v12  ;;  %1653 = vmatmul.bf16.gmra.mxu1 %v1572_v15  ;;  %v1573_v12 = vpack.c.bf16 %v3585_v50, %v3552_v2 }
 0x15b   : > { %1767 = vmatmul.bf16.gmra.mxu2 %v1686_v32 }
 0x15c   : > { %1882 = vmatmul.bf16.gmra.mxu3 %v1134_v44 }
 0x163   : > { %1996 = vmatmul.bf16.gmra.mxu0 %v3562_v53  ;;  %1658 = vmatmul.bf16.gmra.mxu1 %v1573_v12 }
 0x16b   : > { %1772 = vmatmul.bf16.gmra.mxu2 %v1687_v57 }
 0x16c   : > { %1887 = vmatmul.bf16.gmra.mxu3 %v1135_v28 }
 0x173   : > { %2001 = vmatmul.bf16.gmra.mxu0 %v1163_v4  ;;  %1663 = vmatmul.bf16.gmra.mxu1 %v1574_v52 }
 0x17b   : > { %1777 = vmatmul.bf16.gmra.mxu2 %v1688_v46 }
 0x17c   : > { %1892 = vmatmul.bf16.gmra.mxu3 %v1803_v16 }
 0x180   : > { %v1238_v40 = vpop.f32.mrf.mxu1 }
 0x183   : > { %2006 = vmatmul.bf16.gmra.mxu0 %v1917_v13  ;;  %2105 = vmatmul.bf16.vlgmr.msra.gmra.mxu1 %v3523_v60 }
 0x188   : > { %v1240_v2 = vpop.f32.mrf.mxu1 }
 0x18e   : > { %v1315_v51 = vpop.f32.mrf.mxu2 }
 0x18f   : > { %v1421_v18 = vpop.f32.mrf.mxu3  ;;  %v1316_v27 = vadd.f32 %v1315_v51, %v1238_v40  ;;  %v3694_v40 = vld [vmem:[%s3747_s4] ss:$0 sm:$0xff] }
 0x190   : > { %v1243_v53 = vpop.f32.mrf.mxu1  ;;  %v1535_v19 = vpop.f32.mrf.mxu0 }
 0x193   : > { %2110 = vmatmul.bf16.gmra.mxu1 %v3595_v38 }
 0x196   : > { %v1317_v50 = vpop.f32.mrf.mxu2 }
 0x197   : > { %v1423_v23 = vpop.f32.mrf.mxu3  ;;  %v1318_v21 = vadd.f32 %v1317_v50, %v1240_v2 }
 0x198   : > { %v3647_v8 = vpop.f32.mrf.mxu1  ;;  %v1537_v34 = vpop.f32.mrf.mxu0 }
 0x199   : > { %v1442_v15 = vadd.f32 %v1423_v23, %v1318_v21 }
 0x19b   : > { %v1556_v12 = vadd.f32 %v1537_v34, %v1442_v15 }
 0x19e   : > { %v1320_v41 = vpop.f32.mrf.mxu2 }
 0x19f   : > { %v1426_v60 = vpop.f32.mrf.mxu3  ;;  %v1321_v57 = vadd.f32 %v1320_v41, %v1243_v53 }
 0x1a0   : > { %v3649_v20 = vpop.f32.mrf.mxu1  ;;  %v1540_v44 = vpop.f32.mrf.mxu0 }
 0x1a1   : > { %v1443_v46 = vadd.f32 %v1426_v60, %v1321_v57 }
 0x1a3   : > { %2115 = vmatmul.bf16.gmra.mxu1 %v1346_v10  ;;  %v1441_v10 = vadd.f32 %v1421_v18, %v1316_v27  ;;  %v1557_v18 = vadd.f32 %v1540_v44, %v1443_v46 }
 0x1a5   : > { %v1555_v7 = vadd.f32 %v1535_v19, %v1441_v10 }
 0x1a6   : > { %v1322_v38 = vpop.f32.mrf.mxu2 }
 0x1a7   : > { %v1428_v45 = vpop.f32.mrf.mxu3  ;;  %v1323_v19 = vadd.f32 %v1322_v38, %v3647_v8 }
 0x1a8   : > { %v3651_v30 = vpop.f32.mrf.mxu1  ;;  %v3657_v35 = vpop.f32.mrf.mxu0 }
 0x1a9   : > { %v1444_v60 = vadd.f32 %v1428_v45, %v1323_v19 }
 0x1ae   : > { %v3659_v49 = vpop.f32.mrf.mxu2 }
 0x1af   : > { %v3661_v55 = vpop.f32.mrf.mxu3 }
 0x1b0   : > { %v3653_v3 = vpop.f32.mrf.mxu1  ;;  %v3663_v24 = vpop.f32.mrf.mxu0 }
 0x1b3   : > { %2120 = vmatmul.bf16.gmra.mxu1 %v2031_v9 }
 0x1b6   : > { %v3665_v63 = vpop.f32.mrf.mxu2 }
 0x1b7   : > { %v3667_v48 = vpop.f32.mrf.mxu3 }
 0x1b8   : > { %v3655_v47 = vpop.f32.mrf.mxu1  ;;  %v3669_v42 = vpop.f32.mrf.mxu0 }
 0x1be   : > { %v3671_v61 = vpop.f32.mrf.mxu2 }
 0x1bf   : > { %v3673_v62 = vpop.f32.mrf.mxu3 }
 0x1c0   : > { %v1649_v54 = vpop.f32.mrf.mxu1  ;;  %v3675_v43 = vpop.f32.mrf.mxu0 }
 0x1c1   : > { %v1669_v33 = vadd.f32 %v1649_v54, %v1555_v7 }
 0x1c6   : > { %v3677_v58 = vpop.f32.mrf.mxu2 }
 0x1c7   : > { %v3681_v26 = vpop.f32.mrf.mxu3 }
 0x1c8   : > { %v1651_v22 = vpop.f32.mrf.mxu1  ;;  %v3683_v1 = vpop.f32.mrf.mxu0 }
 0x1c9   : > { %v1670_v56 = vadd.f32 %v1651_v22, %v1556_v12  ;;  %v1558_v22 = vadd.f32 %v3657_v35, %v1444_v60 }
 0x1ce   : > { %v1763_v29 = vpop.f32.mrf.mxu2 }
 0x1cf   : > { %v1878_v28 = vpop.f32.mrf.mxu3  ;;  %v1783_v31 = vadd.f32 %v1763_v29, %v1669_v33  ;;  %v1326_v29 = vadd.f32 %v3659_v49, %v3649_v20  ;;  %v1328_v20 = vadd.f32 %v3665_v63, %v3651_v30  ;;  %v1331_v30 = vadd.f32 %v3671_v61, %v3653_v3 }
 0x1d0   : > { %v1654_v5 = vpop.f32.mrf.mxu1  ;;  %v1992_v37 = vpop.f32.mrf.mxu0  ;;  %v1333_v3 = vadd.f32 %v3677_v58, %v3655_v47 }
 0x1d1   : > { %v1898_v52 = vadd.f32 %v1878_v28, %v1783_v31  ;;  %v1671_v41 = vadd.f32 %v1654_v5, %v1557_v18  ;;  %v1445_v45 = vadd.f32 %v3661_v55, %v1326_v29  ;;  %v1446_v55 = vadd.f32 %v3667_v48, %v1328_v20 }
 0x1d3   : > { %v2012_v16 = vadd.f32 %v1992_v37, %v1898_v52  ;;  %v1559_v35 = vadd.f32 %v3663_v24, %v1445_v45  ;;  %v1560_v46 = vadd.f32 %v3669_v42, %v1446_v55 }
 0x1d6   : > { %v1765_v11 = vpop.f32.mrf.mxu2 }
 0x1d7   : > { %v1880_v14 = vpop.f32.mrf.mxu3  ;;  %v1784_v17 = vadd.f32 %v1765_v11, %v1670_v56 }
 0x1d8   : > { %v1656_v4 = vpop.f32.mrf.mxu1  ;;  %v1994_v39 = vpop.f32.mrf.mxu0 }
 0x1d9   : > { %v1899_v50 = vadd.f32 %v1880_v14, %v1784_v17  ;;  %v1672_v10 = vadd.f32 %v1656_v4, %v1558_v22 }
 0x1db   : > { %v2013_v9 = vadd.f32 %v1994_v39, %v1899_v50 }
 0x1de   : > { %v1768_v6 = vpop.f32.mrf.mxu2 }
 0x1df   : > { %v1883_v13 = vpop.f32.mrf.mxu3  ;;  %v1785_v54 = vadd.f32 %v1768_v6, %v1671_v41 }
 0x1e0   : > { %v3679_v0 = vpop.f32.mrf.mxu1  ;;  %v1997_v23 = vpop.f32.mrf.mxu0 }
 0x1e1   : > { %v1900_v27 = vadd.f32 %v1883_v13, %v1785_v54  ;;  %v1673_v31 = vadd.f32 %v3679_v0, %v1559_v35  ;;  %v1447_v13 = vadd.f32 %v3673_v62, %v1331_v30  ;;  %v1448_v62 = vadd.f32 %v3681_v26, %v1333_v3 }
 0x1e3   : > { %v2014_v7 = vadd.f32 %v1997_v23, %v1900_v27  ;;  %v1561_v23 = vadd.f32 %v3675_v43, %v1447_v13  ;;  %v1562_v43 = vadd.f32 %v3683_v1, %v1448_v62 }
 0x1e6   : > { %v1770_v34 = vpop.f32.mrf.mxu2 }
 0x1e7   : > { %v1885_v38 = vpop.f32.mrf.mxu3  ;;  %v1786_v21 = vadd.f32 %v1770_v34, %v1672_v10 }
 0x1e8   : > { %v3685_v36 = vpop.f32.mrf.mxu1  ;;  %v1999_v37 = vpop.f32.mrf.mxu0 }
 0x1e9   : > { %v1901_v49 = vadd.f32 %v1885_v38, %v1786_v21  ;;  %v1674_v0 = vadd.f32 %v3685_v36, %v1560_v46 }
 0x1eb   : > { %v2015_v6 = vadd.f32 %v1999_v37, %v1901_v49 }
 0x1ee   : > { %v1773_v11 = vpop.f32.mrf.mxu2 }
 0x1ef   : > { %v1888_v4 = vpop.f32.mrf.mxu3  ;;  %v1787_v12 = vadd.f32 %v1773_v11, %v1673_v31 }
 0x1f0   : > { %v3687_v59 = vpop.f32.mrf.mxu1  ;;  %v2002_v57 = vpop.f32.mrf.mxu0 }
 0x1f1   : > { %v1902_v63 = vadd.f32 %v1888_v4, %v1787_v12 }
 0x1f6   : > { %v1775_v52 = vpop.f32.mrf.mxu2 }
 0x1f7   : > { %v1890_v48 = vpop.f32.mrf.mxu3 }
 0x1f8   : > { %v3689_v32 = vpop.f32.mrf.mxu1  ;;  %v2004_v50 = vpop.f32.mrf.mxu0 }
 0x1fe   : > { %v1778_v42 = vpop.f32.mrf.mxu2 }
 0x1ff   : > { %v1893_v60 = vpop.f32.mrf.mxu3 }
 0x200   : > { %v2106_v2 = vpop.f32.mrf.mxu1  ;;  %v2007_v58 = vpop.f32.mrf.mxu0 }
 0x201   : > { %v2126_v51 = vadd.f32 %v2106_v2, %v2012_v16  ;;  %v2016_v2 = vadd.f32 %v2002_v57, %v1902_v63 }
 0x203   : > { %v2138_v53 = vadd.f32 %v3694_v40, %v2126_v51  ;;  %v1788_v51 = vadd.f32 %v1775_v52, %v1674_v0 }
 0x205   : > { %v2146_v25 = vmax.f32 %v2138_v53, 0.0  ;;  %v1903_v61 = vadd.f32 %v1890_v48, %v1788_v51  ;;  %v1675_v53 = vadd.f32 %v3687_v59, %v1561_v23  ;;  %v1676_v59 = vadd.f32 %v3689_v32, %v1562_v43 }
 0x207   : > { %2154 = vst [vmem:[%s3702_s7] sm:$0xff] %v2146_v25  ;;  %v2017_v41 = vadd.f32 %v2004_v50, %v1903_v61  ;;  %v1789_v25 = vadd.f32 %v1778_v42, %v1675_v53 }
 0x208   : > { %v2108_v44 = vpop.f32.mrf.mxu1 }
 0x209   : > { %v2127_v8 = vadd.f32 %v2108_v44, %v2013_v9  ;;  %v1904_v44 = vadd.f32 %v1893_v60, %v1789_v25 }
 0x20b   : > { %v2139_v28 = vadd.f32 %v3694_v40, %v2127_v8  ;;  %v1780_v8 = vpop.f32.mrf.mxu2  ;;  %v2018_v22 = vadd.f32 %v2007_v58, %v1904_v44 }
 0x20c   : > { %v1790_v26 = vadd.f32 %v1780_v8, %v1676_v59 }
 0x20d   : > { %v2147_v5 = vmax.f32 %v2139_v28, 0.0  ;;  %v1895_v28 = vpop.f32.mrf.mxu3 }
 0x20e   : > { %v1905_v10 = vadd.f32 %v1895_v28, %v1790_v26 }
 0x20f   : > { %2155 = vst [vmem:[%s3702_s7 + $0x8] sm:$0xff] %v2147_v5  ;;  %v2009_v5 = vpop.f32.mrf.mxu0 }
 0x210   : > { %v2111_v33 = vpop.f32.mrf.mxu1  ;;  %v2019_v11 = vadd.f32 %v2009_v5, %v1905_v10 }
 0x211   : > { %v2128_v14 = vadd.f32 %v2111_v33, %v2014_v7 }
 0x213   : > { %v2140_v15 = vadd.f32 %v3694_v40, %v2128_v14 }
 0x215   : > { %v2148_v39 = vmax.f32 %v2140_v15, 0.0 }
 0x217   : > { %2156 = vst [vmem:[%s3702_s7 + $0x10] sm:$0xff] %v2148_v39 }
 0x218   : > { %v2113_v56 = vpop.f32.mrf.mxu1 }
 0x219   : > { %v2129_v24 = vadd.f32 %v2113_v56, %v2015_v6 }
 0x21b   : > { %v2141_v16 = vadd.f32 %v3694_v40, %v2129_v24 }
 0x21d   : > { %v2149_v17 = vmax.f32 %v2141_v16, 0.0 }
 0x21f   : > { %2157 = vst [vmem:[%s3702_s7 + $0x18] sm:$0xff] %v2149_v17 }
 0x220   : > { %v2116_v18 = vpop.f32.mrf.mxu1 }
 0x221   : > { %v2130_v19 = vadd.f32 %v2116_v18, %v2016_v2 }
 0x223   : > { %v2142_v36 = vadd.f32 %v3694_v40, %v2130_v19 }
 0x225   : > { %v2150_v34 = vmax.f32 %v2142_v36, 0.0 }
 0x227   : > { %2158 = vst [vmem:[%s3702_s7 + $0x20] sm:$0xff] %v2150_v34 }
 0x228   : > { %v2118_v9 = vpop.f32.mrf.mxu1 }
 0x229   : > { %v2131_v54 = vadd.f32 %v2118_v9, %v2017_v41 }
 0x22b   : > { %v2143_v47 = vadd.f32 %v3694_v40, %v2131_v54 }
 0x22d   : > { %v2151_v38 = vmax.f32 %v2143_v47, 0.0 }
 0x22f   : > { %2159 = vst [vmem:[%s3702_s7 + $0x28] sm:$0xff] %v2151_v38 }
 0x230   : > { %v2121_v29 = vpop.f32.mrf.mxu1 }
 0x231   : > { %v2132_v27 = vadd.f32 %v2121_v29, %v2018_v22 }
 0x233   : > { %v2144_v37 = vadd.f32 %v3694_v40, %v2132_v27 }
 0x235   : > { %v2152_v1 = vmax.f32 %v2144_v37, 0.0 }
 0x237   : > { %2160 = vst [vmem:[%s3702_s7 + $0x30] sm:$0xff] %v2152_v1 }
 0x238   : > { %v2123_v45 = vpop.f32.mrf.mxu1 }
 0x239   : > { %v2133_v7 = vadd.f32 %v2123_v45, %v2019_v11 }
 0x23b   : > { %v2145_v21 = vadd.f32 %v3694_v40, %v2133_v7 }
 0x23d   : > { %v2153_v32 = vmax.f32 %v2145_v21, 0.0 }
 0x23f   : > { %2161 = vst [vmem:[%s3702_s7 + $0x38] sm:$0xff] %v2153_v32 }
 0x240 PF: > { %s15_s18 = sadd.s32 1, %s2972_s18  }
 0x241   : > { %p12_p4 = scmp.ge.s32.totalorder %s15_s18, 4  }
 0x243   :  { %14 = sbr.rel (!%p12_p4) target bundleno = 1 (0x1), region = 93 }

</bundles_post_ra>
